<compile_context>
chip_gen: v7x
topology: tpu7x:2x2x1
jax: 0.10.0
libtpu: 0.0.40
codegen_flags: <defaults>
</compile_context>

<pallas_src>
import math

import jax
import jax.numpy as jnp
from jax.experimental import pallas as pl
from jax.experimental.pallas import tpu as pltpu

TWO_PI = 2.0 * math.pi


def _encoder_kernel(xt_ref, w0_ref, b0_ref, w1_ref, b1_ref, w2_ref, b2_ref,
                    out_ref):
    """Feature-major body: refs are (features, batch_tile); params resident."""
    # Layer 0 (2*pi*sw1 folded into W0'/b0'):  (60, D_in) @ (D_in, TB) -> f32.
    h = jnp.dot(w0_ref[...], xt_ref[...],
                preferred_element_type=jnp.float32) + b0_ref[...]
    h = jnp.sin(h)
    # Layer 1 (c1 and 2*pi*sw2 folded into W1'/b1').
    h = jnp.dot(w1_ref[...], h.astype(w1_ref.dtype),
                preferred_element_type=jnp.float32) + b1_ref[...]
    h = jnp.sin(h)
    # Layer 2 (c2 folded into W2').
    out_ref[...] = (jnp.dot(w2_ref[...], h.astype(w2_ref.dtype),
                            preferred_element_type=jnp.float32)
                    + b2_ref[...]).astype(out_ref.dtype)


def _round_up(v, m):
    return ((v + m - 1) // m) * m


def _fold_params(params, compute_dtype):
    """Host-side folds (exact in real arithmetic) + transpose to feature-major."""
    (w0, b0, sw1, sc1, w1, b1, sw2, sc2, w2, b2) = params
    sw1f = (TWO_PI * sw1).astype(jnp.float32)              # (1, 60)
    sw2f = (TWO_PI * sw2).astype(jnp.float32)              # (1, 40)
    w0f = w0 * sw1f                                        # (D_in, 60)
    b0f = b0 * sw1f                                        # (1, 60)
    w1f = (sc1 * w1) * sw2f                                # (60, 40)
    b1f = b1 * sw2f                                        # (1, 40)
    w2f = sc2 * w2                                         # (40, 20)
    b2f = b2                                               # (1, 20)
    # (out_features, in_features) weights, (out_features, 1) biases.
    return (w0f.T.astype(compute_dtype), b0f.T.astype(jnp.float32),
            w1f.T.astype(compute_dtype), b1f.T.astype(jnp.float32),
            w2f.T.astype(compute_dtype), b2f.T.astype(jnp.float32))


def encoder_forward(x, params, *, tile_b=2048, compute_dtype=jnp.bfloat16):
    """params = (W0, b0, sw1, sc1, W1, b1, sw2, sc2, W2, b2).

    Weights stored as (in_dim, out_dim); math matches PyTorch's x @ W.T + b.
    """
    w0t, b0c, w1t, b1c, w2t, b2c = _fold_params(params, compute_dtype)

    B, d_in = x.shape
    d_out = w2t.shape[0]

    # Batch tile is the lane axis -> multiple of 128.  The tail pad is fused
    # with the cast/transpose relayout x needs anyway (no extra full-HBM pass).
    tile_b = max(128, min(_round_up(tile_b, 128), _round_up(B, 128)))
    b_pad = _round_up(B, tile_b)
    xt = jnp.transpose(x).astype(compute_dtype)            # (D_in, B)
    if b_pad != B:
        xt = jnp.pad(xt, ((0, 0), (0, b_pad - B)))
    grid = (b_pad // tile_b,)

    def resident(arr):
        # Constant block index -> DMA'd once, stays VMEM-resident across grid.
        return pl.BlockSpec(arr.shape, lambda i: (0, 0))

    out_t = pl.pallas_call(
        _encoder_kernel,
        out_shape=jax.ShapeDtypeStruct((d_out, b_pad), jnp.float32),
        grid=grid,
        in_specs=[
            pl.BlockSpec((d_in, tile_b), lambda i: (0, i)),   # x^T: streamed
            resident(w0t), resident(b0c),
            resident(w1t), resident(b1c),
            resident(w2t), resident(b2c),
        ],
        out_specs=pl.BlockSpec((d_out, tile_b), lambda i: (0, i)),
        compiler_params=pltpu.CompilerParams(
            dimension_semantics=("parallel",)),
    )(xt, w0t, b0c, w1t, b1c, w2t, b2c)

    out = jnp.transpose(out_t)                              # (b_pad, 20), tiny
    return out[:B] if b_pad != B else out


def _reference_f32(x, params):
    """Pure-f32 module semantics (ground truth)."""
    (w0, b0, sw1, sc1, w1, b1, sw2, sc2, w2, b2) = params
    h = x @ w0 + b0
    h = sc1 * jnp.sin(TWO_PI * h * sw1)
    h = h @ w1 + b1
    h = sc2 * jnp.sin(TWO_PI * h * sw2)
    return (h @ w2 + b2).reshape(-1, w2.shape[1])


def _reference_matched(x, params, compute_dtype):
    """Same folds / cast points as the kernel: validates the kernel mechanics
    independently of the bf16 quantization error."""
    w0t, b0c, w1t, b1c, w2t, b2c = _fold_params(params, compute_dtype)
    xt = jnp.transpose(x).astype(compute_dtype)
    h = jnp.sin(jnp.dot(w0t, xt, preferred_element_type=jnp.float32) + b0c)
    h = jnp.sin(jnp.dot(w1t, h.astype(compute_dtype),
                        preferred_element_type=jnp.float32) + b1c)
    o = jnp.dot(w2t, h.astype(compute_dtype),
                preferred_element_type=jnp.float32) + b2c
    return jnp.transpose(o)


if __name__ == "__main__":
    key = jax.random.PRNGKey(0)
    B, D_in = 8, 32
    layers_dims = (60, 40, 20)
    dims = (D_in,) + layers_dims

    keys = jax.random.split(key, 14)
    x = jax.random.normal(keys[0], (B, D_in), dtype=jnp.float32)

    # Deterministic param init (mimics nn.Linear's uniform(-1/sqrt(fan_in), .)
    # ranges, randn for the sin params); weights stored as (in_dim, out_dim).
    lin_params = []
    ki = 1
    for li in range(3):
        fan_in, fan_out = dims[li], dims[li + 1]
        bound = 1.0 / math.sqrt(fan_in)
        W = jax.random.uniform(keys[ki], (fan_in, fan_out), jnp.float32,
                               -bound, bound)
        ki += 1
        b = jax.random.uniform(keys[ki], (1, fan_out), jnp.float32,
                               -bound, bound)
        ki += 1
        lin_params.append((W, b))

    sw1 = jax.random.normal(keys[ki], (1, layers_dims[0]), jnp.float32); ki += 1
    sc1 = jax.random.normal(keys[ki], (1, 1), jnp.float32); ki += 1
    sw2 = jax.random.normal(keys[ki], (1, layers_dims[1]), jnp.float32); ki += 1
    sc2 = jax.random.normal(keys[ki], (1, 1), jnp.float32); ki += 1

    params = (lin_params[0][0], lin_params[0][1], sw1, sc1,
              lin_params[1][0], lin_params[1][1], sw2, sc2,
              lin_params[2][0], lin_params[2][1])

    # --- exact-semantics check: f32 compute path vs module reference --------
    out_f32 = jax.block_until_ready(
        encoder_forward(x, params, compute_dtype=jnp.float32))
    assert out_f32.shape == (B, layers_dims[-1])
    ref = _reference_f32(x, params)
    assert jnp.allclose(out_f32, ref, atol=1e-4, rtol=1e-4), "f32 mismatch"

    # --- perf path: bf16 matmul operands, f32 accumulation -------------------
    # Compared against a precision-matched reference; the bf16 quantization
    # delta vs the pure-f32 module is expected and not asserted here.
    out_bf16 = jax.block_until_ready(encoder_forward(x, params))
    ref_m = _reference_matched(x, params, jnp.bfloat16)
    assert jnp.allclose(out_bf16, ref_m, atol=5e-3, rtol=5e-3), "bf16 mismatch"

    # --- multi-tile run with a ragged tail (grid + pad/slice path) -----------
    B2 = 300
    x2 = jax.random.normal(keys[ki], (B2, D_in), dtype=jnp.float32)
    out2 = jax.block_until_ready(
        encoder_forward(x2, params, tile_b=128, compute_dtype=jnp.float32))
    assert out2.shape == (B2, layers_dims[-1])
    ref2 = _reference_f32(x2, params)
    assert jnp.allclose(out2, ref2, atol=1e-4, rtol=1e-4), "f32 tiled mismatch"

    out2b = jax.block_until_ready(encoder_forward(x2, params, tile_b=128))
    ref2m = _reference_matched(x2, params, jnp.bfloat16)
    assert jnp.allclose(out2b, ref2m, atol=5e-3, rtol=5e-3), "bf16 tiled mismatch"

    print("KERNEL_OK")
</pallas_src>

<mosaic_0001>
module attributes {stable_mosaic.version = 11 : i64} {
  func.func @_encoder_kernel(%arg0: i32, %arg1: memref<32x128xf32, #tpu.memory_space<vmem>>, %arg2: memref<60x32xf32, #tpu.memory_space<vmem>>, %arg3: memref<60x1xf32, #tpu.memory_space<vmem>>, %arg4: memref<40x60xf32, #tpu.memory_space<vmem>>, %arg5: memref<40x1xf32, #tpu.memory_space<vmem>>, %arg6: memref<20x40xf32, #tpu.memory_space<vmem>>, %arg7: memref<20x1xf32, #tpu.memory_space<vmem>>, %arg8: memref<20x128xf32, #tpu.memory_space<vmem>>) attributes {dimension_semantics = [#tpu.dimension_semantics<parallel>], iteration_bounds = array<i64: 1>, scalar_prefetch = 0 : i64, scratch_operands = 0 : i64, tpu.core_type = #tpu.core_type<tc>, window_params = [{transform_indices = @transform_0, window_bounds = array<i64: 32, 128>}, {pipeline_mode = #tpu.pipeline_mode<synchronous>, transform_indices = @transform_1, window_bounds = array<i64: 60, 32>}, {pipeline_mode = #tpu.pipeline_mode<synchronous>, transform_indices = @transform_2, window_bounds = array<i64: 60, 1>}, {pipeline_mode = #tpu.pipeline_mode<synchronous>, transform_indices = @transform_3, window_bounds = array<i64: 40, 60>}, {pipeline_mode = #tpu.pipeline_mode<synchronous>, transform_indices = @transform_4, window_bounds = array<i64: 40, 1>}, {pipeline_mode = #tpu.pipeline_mode<synchronous>, transform_indices = @transform_5, window_bounds = array<i64: 20, 40>}, {pipeline_mode = #tpu.pipeline_mode<synchronous>, transform_indices = @transform_6, window_bounds = array<i64: 20, 1>}, {transform_indices = @transform_7, window_bounds = array<i64: 20, 128>}]} {
    %c0 = arith.constant 0 : index
    %c0_0 = arith.constant 0 : index
    %0 = vector.load %arg2[%c0, %c0_0] : memref<60x32xf32, #tpu.memory_space<vmem>>, vector<60x32xf32>
    %c0_1 = arith.constant 0 : index
    %c0_2 = arith.constant 0 : index
    %1 = vector.load %arg1[%c0_1, %c0_2] : memref<32x128xf32, #tpu.memory_space<vmem>>, vector<32x128xf32>
    %cst = arith.constant dense<0.000000e+00> : vector<60x128xf32>
    %2 = tpu.matmul %0, %1, %cst {dimension_numbers = #tpu.dot_dimension_numbers<[1], [0], [0], [1], [0, 0, 1, 1], [], []>} : vector<60x32xf32>, vector<32x128xf32>, vector<60x128xf32> -> vector<60x128xf32>
    %c0_3 = arith.constant 0 : index
    %c0_4 = arith.constant 0 : index
    %3 = vector.load %arg3[%c0_3, %c0_4] : memref<60x1xf32, #tpu.memory_space<vmem>>, vector<60x1xf32>
    %4 = vector.broadcast %3 : vector<60x1xf32> to vector<60x128xf32>
    %5 = arith.addf %2, %4 : vector<60x128xf32>
    %6 = math.sin %5 : vector<60x128xf32>
    %c0_5 = arith.constant 0 : index
    %c0_6 = arith.constant 0 : index
    %7 = vector.load %arg4[%c0_5, %c0_6] : memref<40x60xf32, #tpu.memory_space<vmem>>, vector<40x60xf32>
    %cst_7 = arith.constant dense<0.000000e+00> : vector<40x128xf32>
    %8 = tpu.matmul %7, %6, %cst_7 {dimension_numbers = #tpu.dot_dimension_numbers<[1], [0], [0], [1], [0, 0, 1, 1], [], []>} : vector<40x60xf32>, vector<60x128xf32>, vector<40x128xf32> -> vector<40x128xf32>
    %c0_8 = arith.constant 0 : index
    %c0_9 = arith.constant 0 : index
    %9 = vector.load %arg5[%c0_8, %c0_9] : memref<40x1xf32, #tpu.memory_space<vmem>>, vector<40x1xf32>
    %10 = vector.broadcast %9 : vector<40x1xf32> to vector<40x128xf32>
    %11 = arith.addf %8, %10 : vector<40x128xf32>
    %12 = math.sin %11 : vector<40x128xf32>
    %c0_10 = arith.constant 0 : index
    %c0_11 = arith.constant 0 : index
    %13 = vector.load %arg6[%c0_10, %c0_11] : memref<20x40xf32, #tpu.memory_space<vmem>>, vector<20x40xf32>
    %cst_12 = arith.constant dense<0.000000e+00> : vector<20x128xf32>
    %14 = tpu.matmul %13, %12, %cst_12 {dimension_numbers = #tpu.dot_dimension_numbers<[1], [0], [0], [1], [0, 0, 1, 1], [], []>} : vector<20x40xf32>, vector<40x128xf32>, vector<20x128xf32> -> vector<20x128xf32>
    %c0_13 = arith.constant 0 : index
    %c0_14 = arith.constant 0 : index
    %15 = vector.load %arg7[%c0_13, %c0_14] : memref<20x1xf32, #tpu.memory_space<vmem>>, vector<20x1xf32>
    %16 = vector.broadcast %15 : vector<20x1xf32> to vector<20x128xf32>
    %17 = arith.addf %14, %16 : vector<20x128xf32>
    %c0_15 = arith.constant 0 : index
    %c0_16 = arith.constant 0 : index
    %18 = vector.load %arg8[%c0_15, %c0_16] : memref<20x128xf32, #tpu.memory_space<vmem>>, vector<20x128xf32>
    tpu.vector_store %arg8[%c0_15, %c0_16], %17 {strides = array<i32>} : memref<20x128xf32, #tpu.memory_space<vmem>>, vector<20x128xf32>,
    return
  }
  func.func @transform_0(%arg0: i32) -> (i32, i32) {
    %c0_i32 = arith.constant 0 : i32
    %c0_i32_0 = arith.constant 0 : i32
    return %c0_i32, %arg0 : i32, i32
  }
  func.func @transform_1(%arg0: i32) -> (i32, i32) {
    %c0_i32 = arith.constant 0 : i32
    %c0_i32_0 = arith.constant 0 : i32
    %c0_i32_1 = arith.constant 0 : i32
    return %c0_i32, %c0_i32_0 : i32, i32
  }
  func.func @transform_2(%arg0: i32) -> (i32, i32) {
    %c0_i32 = arith.constant 0 : i32
    %c0_i32_0 = arith.constant 0 : i32
    %c0_i32_1 = arith.constant 0 : i32
    return %c0_i32, %c0_i32_0 : i32, i32
  }
  func.func @transform_3(%arg0: i32) -> (i32, i32) {
    %c0_i32 = arith.constant 0 : i32
    %c0_i32_0 = arith.constant 0 : i32
    %c0_i32_1 = arith.constant 0 : i32
    return %c0_i32, %c0_i32_0 : i32, i32
  }
  func.func @transform_4(%arg0: i32) -> (i32, i32) {
    %c0_i32 = arith.constant 0 : i32
    %c0_i32_0 = arith.constant 0 : i32
    %c0_i32_1 = arith.constant 0 : i32
    return %c0_i32, %c0_i32_0 : i32, i32
  }
  func.func @transform_5(%arg0: i32) -> (i32, i32) {
    %c0_i32 = arith.constant 0 : i32
    %c0_i32_0 = arith.constant 0 : i32
    %c0_i32_1 = arith.constant 0 : i32
    return %c0_i32, %c0_i32_0 : i32, i32
  }
  func.func @transform_6(%arg0: i32) -> (i32, i32) {
    %c0_i32 = arith.constant 0 : i32
    %c0_i32_0 = arith.constant 0 : i32
    %c0_i32_1 = arith.constant 0 : i32
    return %c0_i32, %c0_i32_0 : i32, i32
  }
  func.func @transform_7(%arg0: i32) -> (i32, i32) {
    %c0_i32 = arith.constant 0 : i32
    %c0_i32_0 = arith.constant 0 : i32
    return %c0_i32, %arg0 : i32, i32
  }
}

</mosaic_0001>

<bundles_post_ra>
// kernel: tpu_custom_call.1
= control target key start
LH: loop header
LB: loop body
LE: loop exit
PB: predicated region body
PF: predicated region fallthrough
CT: control target
= control target key end

     0   :  { %vm87_vm0 = vcmask 261120   ;;  %v2187_v6 = vmov 0   ;;  %s3417_s0 = inlined_call_operand.vmem [shape: f32[32,128], index: 0, kind: input, shape index: {}]   ;;  %s3418_s1 = inlined_call_operand.vmem [shape: f32[60,32], index: 1, kind: input, shape index: {}]   ;;  %s3419_s2 = inlined_call_operand.vmem [shape: f32[60,1], index: 2, kind: input, shape index: {}]   ;;  %s3420_s3 = inlined_call_operand.vmem [shape: f32[40,60], index: 3, kind: input, shape index: {}]   ;;  %s3421_s4 = inlined_call_operand.vmem [shape: f32[40,1], index: 4, kind: input, shape index: {}]   ;;  %s3422_s5 = inlined_call_operand.vmem [shape: f32[20,40], index: 5, kind: input, shape index: {}]   ;;  %s3423_s6 = inlined_call_operand.vmem [shape: f32[20,1], index: 6, kind: input, shape index: {}]   ;;  %s3424_s7 = inlined_call_operand.hbm [shape: f32[20,128], index: 7, kind: output, shape index: {}]  }
   0x1   :  { %v35_v0 = vld [vmem:[%s3417_s0] sm:$0xff]  ;;  %v36_v1 = vld [vmem:[%s3417_s0 + $0x8] sm:$0xff]  ;;  %v37_v2 = vld [vmem:[%s3417_s0 + $0x10] sm:$0xff]  ;;  %2109 = vset.pattern.permute.xlu0 %v2187_v6  ;;  %2110 = vset.pattern.permute.xlu1 %v2187_v6 }
   0x2   :  { %v2016_v3 = vpack.c.bf16 %v36_v1, %v35_v0  ;;  %v38_v4 = vld [vmem:[%s3417_s0 + $0x18] sm:$0xff]  ;;  %v27_v5 = vld [vmem:[%s3418_s1] sm:$0xff]  ;;  %v41_v9 = vld [vmem:[%s3419_s2 + $0x10] sm:$0xff] }
   0x3   :  { %v2020_v7 = vpack.c.bf16 %v38_v4, %v37_v2  ;;  %1954 = vmatprep.mubr.msk.f32.mxu0 %vm87_vm0, %v27_v5  ;;  %v39_v8 = vld [vmem:[%s3419_s2] sm:$0xff]  ;;  %59 = vperm.xlu1 %2110, %v41_v9   ;;  %v40_v10 = vld [vmem:[%s3419_s2 + $0x8] sm:$0xff]  ;;  %v42_v11 = vld [vmem:[%s3419_s2 + $0x18] sm:$0xff] }
   0x4   :  { %2017 = vmatprep.subr.bf16.mxu0 %v2016_v3  ;;  %49 = vperm.xlu0 %2109, %v39_v8   ;;  %v28_v12 = vld [vmem:[%s3418_s1 + $0x8] sm:$0xff]  ;;  %v29_v13 = vld [vmem:[%s3418_s1 + $0x10] sm:$0xff] }
   0x5   :  { %2019 = vmatpush3.bf16.msra.mxu0 %v2016_v3 }
   0x6   :  { %2021 = vmatprep.subr.bf16.mxu0 %v2020_v7 }
   0x8   :  { %54 = vperm.xlu0 %2109, %v40_v10  }
   0x9   :  { %2023 = vmatpush3.bf16.msra.mxu0 %v2020_v7 }
   0xa   :  { %12 = vsyncpa [#allocation3], 0  ;;  %64 = vperm.xlu1 %2110, %v42_v11   ;;  %v43_v14 = vld [vmem:[%s3419_s2 + $0x20] sm:$0xff]  ;;  %v44_v15 = vld [vmem:[%s3419_s2 + $0x28] sm:$0xff]  ;;  %s2198_s18 = smov [#allocation2]  }
   0xb   :  { %v30_v16 = vld [vmem:[%s3418_s1 + $0x18] sm:$0xff]  ;;  %v31_v17 = vld [vmem:[%s3418_s1 + $0x20] sm:$0xff]  ;;  %v45_v18 = vld [vmem:[%s3419_s2 + $0x30] sm:$0xff]  ;;  %s1833_s19 = sshll.u32 %s2198_s18, 4  ;;  %s1834_s19 = int_to_ptr.vmem [resolvable:$true] %s1833_s19 }
   0xc   :  { %1955 = vmatmul.mubr.msk.f32.vlgmr.msra.gmra.mrb[0].mxu0 %vm87_vm0, %v28_v12  ;;  %69 = vperm.xlu0 %2109, %v43_v14   ;;  %v46_v19 = vld [vmem:[%s3419_s2 + $0x38] sm:$0xf]  ;;  %v32_v20 = vld [vmem:[%s3418_s1 + $0x28] sm:$0xff]  ;;  %v33_v21 = vld [vmem:[%s3418_s1 + $0x30] sm:$0xff]  ;;  %v2188_v12 = vmov 683565275   ;;  %p2168_p1 = scmp.lt.s32.totalorder %s1834_s19, %s1834_s19 }
   0xd   :  { %1957 = vmatprep.mubr.msk.f32.mxu0 %vm87_vm0, %v29_v13  ;;  %v1054_v22 = vld [vmem:[%s3421_s4] sm:$0xff]  ;;  %v1055_v23 = vld [vmem:[%s3421_s4 + $0x8] sm:$0xff]  ;;  %v34_v24 = vld [vmem:[%s3418_s1 + $0x38] sm:$0xf]  ;;  %v2189_v14 = vmov 2475754826  }
   0xe   :  { %74 = vperm.xlu1 %2110, %v44_v15   ;;  %v1056_v25 = vld [vmem:[%s3421_s4 + $0x10] sm:$0xff]  ;;  %v1057_v26 = vld [vmem:[%s3421_s4 + $0x18] sm:$0xff]  ;;  %v1058_v27 = vld [vmem:[%s3421_s4 + $0x20] sm:$0xff] }
   0xf   :  { %v1717_v28 = vld [vmem:[%s3423_s6] sm:$0xff]  ;;  %v1718_v29 = vld [vmem:[%s3423_s6 + $0x8] sm:$0xff]  ;;  %v1719_v30 = vld [vmem:[%s3423_s6 + $0x10] sm:$0xf] }
  0x10   :  { %1958 = vmatmul.mubr.msk.f32.gmra.mrb[2].mxu0 %vm87_vm0, %v30_v16  ;;  %79 = vperm.xlu0 %2109, %v45_v18  }
  0x11   :  { %1960 = vmatprep.mubr.msk.f32.mxu0 %vm87_vm0, %v31_v17  ;;  %v2190_v17 = vmov 2131351028  }
  0x12   :  { %84 = vperm.xlu1 %2110, %v46_v19   ;;  %v2191_v19 = vmov 2102212464  }
  0x14   :  { %1961 = vmatmul.mubr.msk.f32.gmra.mrb[4].mxu0 %vm87_vm0, %v32_v20  ;;  %1061 = vperm.xlu0 %2109, %v1054_v22  }
  0x15   :  { %1963 = vmatprep.mubr.msk.f32.mxu0 %vm87_vm0, %v33_v21  ;;  %v2192_v21 = vmov 920167782  }
  0x16   :  { %1066 = vperm.xlu1 %2110, %v1055_v23  }
  0x18   :  { %1964 = vmatmul.mubr.msk.f32.gmra.mrb[6].mxu0 %vm87_vm0, %v34_v24  ;;  %1071 = vperm.xlu0 %2109, %v1056_v25  }
  0x1a   :  { %1076 = vperm.xlu1 %2110, %v1057_v26  }
  0x1c   :  { %1081 = vperm.xlu0 %2109, %v1058_v27  }
  0x1e   :  { %1722 = vperm.xlu1 %2110, %v1717_v28   ;;  %v2193_v28 = vmov 1326507024  }
  0x20   :  { %1727 = vperm.xlu0 %2109, %v1718_v29  }
  0x22   :  { %1732 = vperm.xlu1 %2110, %v1719_v30  }
  0x82   :  { %v60_v32 = vpop.permute.xlu1 %59 }
  0x83   :  { %v50_v31 = vpop.permute.xlu0 %49 }
  0x87   :  { %v55_v33 = vpop.permute.xlu0 %54 }
  0x89   :  { %v65_v40 = vpop.permute.xlu1 %64 }
  0xdf   :  { %v1956_v34 = vpop.f32.mrb[0].mxu0 }
  0xe0   :  { %v2333_v35 = vadd.f32 %v1956_v34, %v55_v33  ;;  %v178_v36 = vpop.f32.mrb[1].mxu0 }
  0xe1   :  { %v2335_v37 = vadd.f32 %v178_v36, %v50_v31 }
  0xe2   :  { %v321_v38 = vand.u32 2147483647, %v2333_v35  ;;  %v324_v39 = vand.u32 2139095040, %v2333_v35 }
  0xe3   :  { %v217_v41 = vand.u32 2147483647, %v2335_v37  ;;  %v220_v42 = vand.u32 2139095040, %v2335_v37  ;;  %v1959_v43 = vpop.f32.mrb[2].mxu0 }
  0xe4   :  { %v325_v44 = vshrl.u32 %v324_v39, 23  ;;  %v328_v45 = vand.u32 8388607, %v321_v38  ;;  %v2343_v46 = vadd.f32 %v1959_v43, %v65_v40  ;;  %v188_v47 = vpop.f32.mrb[3].mxu0 }
  0xe5   :  { %v221_v48 = vshrl.u32 %v220_v42, 23  ;;  %v224_v49 = vand.u32 8388607, %v217_v41  ;;  %v2357_v0 = vadd.f32 %v188_v47, %v60_v32 }
  0xe6   :  { %v1856_v50 = vadd.s32 4294967169, %v325_v44  ;;  %v529_v51 = vand.u32 2147483647, %v2343_v46  ;;  %v532_v53 = vand.u32 2139095040, %v2343_v46  ;;  %v329_v55 = vor.u32 8388608, %v328_v45 }
  0xe7   :  { %v1852_v52 = vadd.s32 4294967169, %v221_v48  ;;  %v2349_v54 = vpop.f32.mrb[4].mxu0  ;;  %v225_v57 = vor.u32 8388608, %v224_v49 }
  0xe8   :  { %v331_v56 = vadd.s32 1, %v1856_v50  ;;  %v533_v59 = vshrl.u32 %v532_v53, 23  ;;  %v2353_v60 = vand.u32 8388607, %v529_v51  ;;  %v2355_v61 = vpop.f32.mrb[5].mxu0  ;;  %v2361_v4 = vshll.u32 %v329_v55, 8 }
  0xe9   :  { %v227_v58 = vadd.s32 1, %v1852_v52  ;;  %v2367_v9 = vshll.u32 %v225_v57, 8 }
  0xea   :  { %vm332_vm1 = vcmp.gt.s32.totalorder %v331_v56, 0  ;;  %v1864_v63 = vadd.s32 4294967169, %v533_v59  ;;  %v537_v10 = vor.u32 8388608, %v2353_v60 }
  0xeb   :  { %v333_v62 = vsel %vm332_vm1, %v331_v56, 0  ;;  %vm228_vm2 = vcmp.gt.s32.totalorder %v227_v58, 0  ;;  %v2359_v1 = vpop.f32.mrb[6].mxu0 }
  0xec   :  { %v334_v2 = vshrl.u32 %v333_v62, 5  ;;  %v335_v3 = vand.u32 31, %v333_v62  ;;  %v229_v5 = vsel %vm228_vm2, %v227_v58, 0  ;;  %v2363_v6 = vpop.f32.mrb[7].mxu0  ;;  %v2372_v16 = vadd.s32 1, %v1864_v63 }
  0xed   :  { %v2365_v7 = vshrl.u32 %v229_v5, 5  ;;  %v231_v8 = vand.u32 31, %v229_v5 }
  0xee   :  { %v336_v11 = vsub.s32 32, %v335_v3  ;;  %v338_v13 = vshll.u32 %v2188_v12, %v335_v3  ;;  %v341_v15 = vshll.u32 %v2189_v14, %v335_v3  ;;  %v344_v18 = vshll.u32 %v2190_v17, %v335_v3 }
  0xef   :  { %v347_v20 = vshll.u32 %v2191_v19, %v335_v3  ;;  %v350_v22 = vshll.u32 %v2192_v21, %v335_v3  ;;  %vm353_vm3 = vcmp.lt.s32.totalorder %v334_v2, 1  ;;  %vm354_vm4 = vcmp.lt.s32.totalorder %v334_v2, 2 }
  0xf0   :  { %v339_v23 = vshrl.u32 %v2189_v14, %v336_v11  ;;  %v342_v24 = vshrl.u32 %v2190_v17, %v336_v11  ;;  %v345_v25 = vshrl.u32 %v2191_v19, %v336_v11  ;;  %v337_v26 = vshrl.u32 %v2188_v12, %v336_v11 }
  0xf1   :  { %v348_v27 = vshrl.u32 %v2192_v21, %v336_v11  ;;  %v351_v29 = vshrl.u32 %v2193_v28, %v336_v11  ;;  %vm355_vm5 = vcmp.lt.s32.totalorder %v334_v2, 3  ;;  %v232_v33 = vsub.s32 32, %v231_v8 }
  0xf2   :  { %v340_v30 = vor.u32 %v339_v23, %v338_v13  ;;  %v343_v31 = vor.u32 %v342_v24, %v341_v15  ;;  %v346_v32 = vor.u32 %v345_v25, %v344_v18  ;;  %vm356_vm6 = vcmp.lt.s32.totalorder %v334_v2, 4 }
  0xf3   :  { %v349_v34 = vor.u32 %v348_v27, %v347_v20  ;;  %v352_v36 = vor.u32 %v351_v29, %v350_v22  ;;  %v234_v39 = vshll.u32 %v2188_v12, %v231_v8  ;;  %v237_v49 = vshll.u32 %v2189_v14, %v231_v8 }
  0xf4   :  { %v357_v40 = vsel %vm353_vm3, %v337_v26, %v340_v30  ;;  %v358_v42 = vsel %vm356_vm6, %v346_v32, 2102212464  ;;  %v361_v43 = vsel %vm353_vm3, %v340_v30, %v343_v31  ;;  %v365_v44 = vsel %vm353_vm3, %v343_v31, %v346_v32 }
  0xf5   :  { %v359_v45 = vsel %vm355_vm5, %v343_v31, %v358_v42  ;;  %v362_v47 = vsel %vm356_vm6, %v349_v34, 920167782  ;;  %v366_v48 = vsel %vm356_vm6, %v352_v36, 1326507024  ;;  %v233_v53 = vshrl.u32 %v2188_v12, %v232_v33 }
  0xf6   :  { %v363_v50 = vsel %vm355_vm5, %v346_v32, %v362_v47  ;;  %v367_v52 = vsel %vm355_vm5, %v349_v34, %v366_v48  ;;  %v235_v55 = vshrl.u32 %v2189_v14, %v232_v33  ;;  %v360_v56 = vsel %vm354_vm4, %v357_v40, %v359_v45 }
  0xf7   :  { %v364_v57 = vsel %vm354_vm4, %v361_v43, %v363_v50  ;;  %v368_v58 = vsel %vm354_vm4, %v365_v44, %v367_v52  ;;  %v238_v59 = vshrl.u32 %v2190_v17, %v232_v33  ;;  %v240_v15 = vshll.u32 %v2190_v17, %v231_v8 }
  0xf8   :  { %v2398_v62 = vmul.u32.u64.low %v2361_v4, %v368_v58  ;;  %v2399_v63 = vmul.u32.u64.high %v2361_v4, %v368_v58, %v2398_v62  ;;  %v2402_v3 = vmul.u32.u64.low %v2361_v4, %v364_v57  ;;  %v2403_v5 = vmul.u32.u64.high %v2361_v4, %v364_v57, %v2402_v3 }
  0xf9   :  { %v236_v11 = vor.u32 %v235_v55, %v234_v39  ;;  %v239_v13 = vor.u32 %v238_v59, %v237_v49  ;;  %v241_v18 = vshrl.u32 %v2191_v19, %v232_v33  ;;  %v376_v2 = vmul.u32 %v2361_v4, %v360_v56 }
  0xfa   :  { %v243_v20 = vshll.u32 %v2191_v19, %v231_v8  ;;  %v244_v22 = vshrl.u32 %v2192_v21, %v232_v33  ;;  %v247_v23 = vshrl.u32 %v2193_v28, %v232_v33  ;;  %v246_v25 = vshll.u32 %v2192_v21, %v231_v8 }
  0xfb   :  { %v242_v24 = vor.u32 %v241_v18, %v240_v15  ;;  %vm249_vm7 = vcmp.lt.s32.totalorder %v2365_v7, 1  ;;  %vm250_vm8 = vcmp.lt.s32.totalorder %v2365_v7, 2  ;;  %vm378_vm9 = vc.u32 %v2399_v63, %v2402_v3 }
  0xfc   :  { %v379_v26 = vadd.s32 1, %v2403_v5  ;;  %v245_v27 = vor.u32 %v244_v22, %v243_v20  ;;  %vm251_vm10 = vcmp.lt.s32.totalorder %v2365_v7, 3  ;;  %v248_v4 = vor.u32 %v247_v23, %v246_v25 }
  0xfd   :  { %vm252_vm11 = vcmp.lt.s32.totalorder %v2365_v7, 4  ;;  %v253_v29 = vsel %vm249_vm7, %v233_v53, %v236_v11  ;;  %v257_v30 = vsel %vm249_vm7, %v236_v11, %v239_v13  ;;  %v261_v33 = vsel %vm249_vm7, %v239_v13, %v242_v24 }
  0xfe   :  { %v380_v31 = vsel %vm378_vm9, %v379_v26, %v2403_v5  ;;  %v254_v8 = vsel %vm252_vm11, %v242_v24, 2102212464  ;;  %v258_v32 = vsel %vm252_vm11, %v245_v27, 920167782  ;;  %v262_v40 = vsel %vm252_vm11, %v248_v4, 1326507024 }
  0xff   :  { %v381_v34 = vadd.s32 %v380_v31, %v376_v2  ;;  %v255_v36 = vsel %vm251_vm10, %v239_v13, %v254_v8  ;;  %v259_v39 = vsel %vm251_vm10, %v242_v24, %v258_v32  ;;  %v263_v43 = vsel %vm251_vm10, %v245_v27, %v262_v40 }
 0x100   :  { %v260_v42 = vsel %vm250_vm8, %v257_v30, %v259_v39  ;;  %vm540_vm12 = vcmp.gt.s32.totalorder %v2372_v16, 0  ;;  %v428_v44 = vand.u32 2139095040, %v2357_v0  ;;  %v264_v47 = vsel %vm250_vm8, %v261_v33, %v263_v43 }
 0x101   :  { %v382_v45 = vadd.s32 536870912, %v381_v34  ;;  %v2428_v48 = vmul.u32.u64.low %v2367_v9, %v260_v42  ;;  %v2429_v49 = vmul.u32.u64.high %v2367_v9, %v260_v42, %v2428_v48  ;;  %v256_v50 = vsel %vm250_vm8, %v253_v29, %v255_v36 }
 0x102   :  { %v2435_v52 = vmul.u32.u64.low %v2367_v9, %v264_v47  ;;  %v2436_v53 = vmul.u32.u64.high %v2367_v9, %v264_v47, %v2435_v52  ;;  %v541_v55 = vsel %vm540_vm12, %v2372_v16, 0  ;;  %v2443_v58 = vshll.u32 %v537_v10, 8 }
 0x103   :  { %v2439_v56 = vshrl.u32 %v382_v45, 30  ;;  %v543_v57 = vand.u32 31, %v541_v55  ;;  %v425_v59 = vand.u32 2147483647, %v2357_v0  ;;  %v429_v62 = vshrl.u32 %v428_v44, 23 }
 0x104   :  { %v272_v7 = vmul.u32 %v2367_v9, %v256_v50  ;;  %v275_v11 = vadd.s32 1, %v2429_v49  ;;  %vm274_vm13 = vc.u32 %v2436_v53, %v2428_v48  ;;  %v542_v16 = vshrl.u32 %v541_v55, 5 }
 0x105   :  { %v384_v5 = vshll.u32 %v2439_v56, 30  ;;  %v544_v13 = vsub.s32 32, %v543_v57  ;;  %v546_v15 = vshll.u32 %v2188_v12, %v543_v57  ;;  %v549_v60 = vshll.u32 %v2189_v14, %v543_v57 }
 0x106   :  { %v276_v18 = vsel %vm274_vm13, %v275_v11, %v2429_v49  ;;  %v552_v20 = vshll.u32 %v2190_v17, %v543_v57  ;;  %v555_v24 = vshll.u32 %v2191_v19, %v543_v57  ;;  %v558_v4 = vshll.u32 %v2192_v21, %v543_v57 }
 0x107   :  { %v2453_v10 = vsub.s32 %v381_v34, %v384_v5  ;;  %v547_v2 = vshrl.u32 %v2189_v14, %v544_v13  ;;  %v277_v9 = vadd.s32 %v276_v18, %v272_v7  ;;  %v550_v22 = vshrl.u32 %v2190_v17, %v544_v13 }
 0x108   :  { %v553_v23 = vshrl.u32 %v2191_v19, %v544_v13  ;;  %v556_v27 = vshrl.u32 %v2192_v21, %v544_v13  ;;  %v559_v8 = vshrl.u32 %v2193_v28, %v544_v13  ;;  %v545_v33 = vshrl.u32 %v2188_v12, %v544_v13 }
 0x109   :  { %v387_v25 = vsub.s32 0, %v2453_v10  ;;  %v548_v26 = vor.u32 %v547_v2, %v546_v15  ;;  %v278_v29 = vadd.s32 536870912, %v277_v9  ;;  %v551_v30 = vor.u32 %v550_v22, %v549_v60 }
 0x10a   :  { %v554_v31 = vor.u32 %v553_v23, %v552_v20  ;;  %v557_v34 = vor.u32 %v556_v27, %v555_v24  ;;  %v1860_v36 = vadd.s32 4294967169, %v429_v62  ;;  %v560_v40 = vor.u32 %v559_v8, %v558_v4 }
 0x10b   :  { %v1857_v32 = vmin.u32 %v387_v25, %v2453_v10  ;;  %v2467_v39 = vshrl.u32 %v278_v29, 30  ;;  %vm561_vm14 = vcmp.lt.s32.totalorder %v542_v16, 1  ;;  %vm564_vm15 = vcmp.lt.s32.totalorder %v542_v16, 4 }
 0x10c   :  { %vm562_vm0 = vcmp.lt.s32.totalorder %v542_v16, 2  ;;  %v566_v43 = vsel %vm564_vm15, %v554_v31, 2102212464  ;;  %v569_v44 = vsel %vm561_vm14, %v548_v26, %v551_v30  ;;  %vm563_vm1 = vcmp.lt.s32.totalorder %v542_v16, 3 }
 0x10d   :  { %v389_v42 = vclz %v1857_v32  ;;  %v280_v45 = vshll.u32 %v2467_v39, 30  ;;  %v570_v47 = vsel %vm564_vm15, %v557_v34, 920167782  ;;  %v573_v49 = vsel %vm561_vm14, %v551_v30, %v554_v31  ;;  %v75_v32 = vpop.permute.xlu1 %74 }
 0x10e   :  { %v565_v52 = vsel %vm561_vm14, %v545_v33, %v548_v26  ;;  %v571_v55 = vsel %vm563_vm1, %v554_v31, %v570_v47  ;;  %v574_v57 = vsel %vm564_vm15, %v560_v40, 1326507024  ;;  %v567_v62 = vsel %vm563_vm1, %v551_v30, %v566_v43 }
 0x10f   :  { %v1858_v50 = vadd.s32 4294967294, %v389_v42  ;;  %v2470_v5 = vsub.s32 %v277_v9, %v280_v45  ;;  %v572_v7 = vsel %vm562_vm0, %v569_v44, %v571_v55  ;;  %v575_v11 = vsel %vm563_vm1, %v557_v34, %v574_v57  ;;  %v70_v42 = vpop.permute.xlu0 %69 }
 0x110   :  { %v576_v13 = vsel %vm562_vm0, %v573_v49, %v575_v11  ;;  %v2475_v15 = vmul.u32.u64.low %v2443_v58, %v572_v7  ;;  %v2476_v60 = vmul.u32.u64.high %v2443_v58, %v572_v7, %v2475_v15  ;;  %v568_v9 = vsel %vm562_vm0, %v565_v52, %v567_v62 }
 0x111   :  { %vm1859_vm2 = vcmp.lt.s32.totalorder %v1858_v50, 0  ;;  %v283_v2 = vsub.s32 0, %v2470_v5  ;;  %v2480_v20 = vmul.u32.u64.low %v2443_v58, %v576_v13  ;;  %v2481_v22 = vmul.u32.u64.high %v2443_v58, %v576_v13, %v2480_v20 }
 0x112   :  { %v392_v18 = vsel %vm1859_vm2, 0, %v1858_v50  ;;  %v432_v23 = vand.u32 8388607, %v425_v59  ;;  %v435_v24 = vadd.s32 1, %v1860_v36  ;;  %v587_v27 = vadd.s32 1, %v2476_v60 }
 0x113   :  { %v397_v25 = vsub.s32 4294967266, %v392_v18  ;;  %v1853_v26 = vmin.u32 %v283_v2, %v2470_v5  ;;  %v584_v29 = vmul.u32 %v2443_v58, %v568_v9  ;;  %vm586_vm4 = vc.u32 %v2481_v22, %v2475_v15 }
 0x114   :  { %vm436_vm3 = vcmp.gt.s32.totalorder %v435_v24, 0  ;;  %v393_v31 = vsub.s32 32, %v392_v18  ;;  %v588_v16 = vsel %vm586_vm4, %v587_v27, %v2476_v60  ;;  %v433_v8 = vor.u32 8388608, %v432_v23 }
 0x115   :  { %v285_v4 = vclz %v1853_v26  ;;  %v437_v30 = vsel %vm436_vm3, %v435_v24, 0  ;;  %v398_v33 = vadd.s32 127, %v397_v25  ;;  %v589_v36 = vadd.s32 %v588_v16, %v584_v29 }
 0x116   :  { %v439_v40 = vand.u32 31, %v437_v30  ;;  %v377_v43 = vadd.s32 %v2402_v3, %v2399_v63  ;;  %v2494_v44 = vadd.f32 %v2349_v54, %v75_v32  ;;  %v2497_v47 = vadd.f32 %v2355_v61, %v70_v42 }
 0x117   :  { %v1854_v34 = vadd.s32 4294967294, %v285_v4  ;;  %v590_v58 = vadd.s32 536870912, %v589_v36  ;;  %v394_v49 = vshll.u32 %v2453_v10, %v392_v18  ;;  %v273_v52 = vadd.s32 %v2428_v48, %v2436_v53 }
 0x118   :  { %v440_v45 = vsub.s32 32, %v439_v40  ;;  %v395_v50 = vshrl.u32 %v377_v43, %v393_v31  ;;  %v399_v57 = vshll.u32 %v398_v33, 23  ;;  %v2507_v54 = vshll.u32 %v433_v8, 8 }
 0x119   :  { %vm1855_vm5 = vcmp.lt.s32.totalorder %v1854_v34, 0  ;;  %v2505_v3 = vshrl.u32 %v590_v58, 30  ;;  %v438_v62 = vshrl.u32 %v437_v30, 5  ;;  %v442_v7 = vshll.u32 %v2188_v12, %v439_v40 }
 0x11a   :  { %v2502_v55 = vsel %vm1855_vm5, 0, %v1854_v34  ;;  %v443_v61 = vshrl.u32 %v2189_v14, %v440_v45  ;;  %v446_v10 = vshrl.u32 %v2190_v17, %v440_v45  ;;  %v445_v48 = vshll.u32 %v2189_v14, %v439_v40 }
 0x11b   :  { %v293_v63 = vsub.s32 4294967266, %v2502_v55  ;;  %v592_v11 = vshll.u32 %v2505_v3, 30  ;;  %v448_v53 = vshll.u32 %v2190_v17, %v439_v40  ;;  %v449_v13 = vshrl.u32 %v2191_v19, %v440_v45 }
 0x11c   :  { %v2516_v60 = vor.u32 %v395_v50, %v394_v49  ;;  %v585_v2 = vadd.s32 %v2475_v15, %v2481_v22  ;;  %v737_v20 = vand.u32 2147483647, %v2494_v44  ;;  %v444_v23 = vor.u32 %v443_v61, %v442_v7 }
 0x11d   :  { %v294_v18 = vadd.s32 127, %v293_v63  ;;  %v2520_v9 = vsub.s32 %v589_v36, %v592_v11  ;;  %v447_v24 = vor.u32 %v446_v10, %v445_v48  ;;  %v450_v25 = vor.u32 %v449_v13, %v448_v53 }
 0x11e   :  { %v451_v26 = vshll.u32 %v2191_v19, %v439_v40  ;;  %v452_v27 = vshrl.u32 %v2192_v21, %v440_v45  ;;  %v454_v4 = vshll.u32 %v2192_v21, %v439_v40  ;;  %v455_v29 = vshrl.u32 %v2193_v28, %v440_v45 }
 0x11f   :  { %v2526_v30 = vor.u32 4788187, %v399_v57  ;;  %v289_v31 = vsub.s32 32, %v2502_v55  ;;  %v595_v15 = vsub.s32 0, %v2520_v9  ;;  %vm457_vm6 = vcmp.lt.s32.totalorder %v438_v62, 1 }
 0x120   :  { %v441_v22 = vshrl.u32 %v2188_v12, %v440_v45  ;;  %v453_v16 = vor.u32 %v452_v27, %v451_v26  ;;  %v456_v8 = vor.u32 %v455_v29, %v454_v4  ;;  %vm460_vm7 = vcmp.lt.s32.totalorder %v438_v62, 4 }
 0x121   :  { %v295_v32 = vshll.u32 %v294_v18, 23  ;;  %v1865_v33 = vmin.u32 %v595_v15, %v2520_v9  ;;  %v462_v34 = vsel %vm460_vm7, %v450_v25, 2102212464  ;;  %v465_v36 = vsel %vm457_vm6, %v444_v23, %v447_v24 }
 0x122   :  { %vm459_vm8 = vcmp.lt.s32.totalorder %v438_v62, 3  ;;  %v466_v40 = vsel %vm460_vm7, %v453_v16, 920167782  ;;  %v469_v42 = vsel %vm457_vm6, %v447_v24, %v450_v25  ;;  %v470_v43 = vsel %vm460_vm7, %v456_v8, 1326507024 }
 0x123   :  { %v597_v58 = vclz %v1865_v33  ;;  %vm458_vm9 = vcmp.lt.s32.totalorder %v438_v62, 2  ;;  %v461_v49 = vsel %vm457_vm6, %v441_v22, %v444_v23  ;;  %v467_v50 = vsel %vm459_vm8, %v450_v25, %v466_v40 }
 0x124   :  { %v463_v57 = vsel %vm459_vm8, %v447_v24, %v462_v34  ;;  %v468_v63 = vsel %vm458_vm9, %v465_v36, %v467_v50  ;;  %v471_v7 = vsel %vm459_vm8, %v453_v16, %v470_v43  ;;  %v740_v45 = vand.u32 2139095040, %v2494_v44 }
 0x125   :  { %v291_v61 = vshrl.u32 %v273_v52, %v289_v31  ;;  %v296_v10 = vor.u32 4788187, %v295_v32  ;;  %v1866_v11 = vadd.s32 4294967294, %v597_v58  ;;  %v472_v48 = vsel %vm458_vm9, %v469_v42, %v471_v7 }
 0x126   :  { %v2534_v53 = vmul.u32.u64.low %v2507_v54, %v472_v48  ;;  %v2535_v13 = vmul.u32.u64.high %v2507_v54, %v472_v48, %v2534_v53  ;;  %v2538_v18 = vmul.u32.u64.low %v2507_v54, %v468_v63  ;;  %v2539_v26 = vmul.u32.u64.high %v2507_v54, %v468_v63, %v2538_v18 }
 0x127   :  { %v290_v62 = vshll.u32 %v2470_v5, %v2502_v55  ;;  %vm1867_vm10 = vcmp.lt.s32.totalorder %v1866_v11, 0  ;;  %v464_v23 = vsel %vm458_vm9, %v461_v49, %v463_v57  ;;  %v741_v24 = vshrl.u32 %v740_v45, 23 }
 0x128   :  { %v401_v52 = vand.u32 2147483647, %v2526_v30  ;;  %v600_v25 = vsel %vm1867_vm10, 0, %v1866_v11  ;;  %v744_v27 = vand.u32 8388607, %v737_v20  ;;  %v636_v4 = vand.u32 2139095040, %v2497_v47 }
 0x129   :  { %v292_v29 = vor.u32 %v291_v61, %v290_v62  ;;  %v601_v31 = vsub.s32 32, %v600_v25  ;;  %v605_v15 = vsub.s32 4294967266, %v600_v25  ;;  %v1872_v22 = vadd.s32 4294967169, %v741_v24 }
 0x12a   :  { %v297_v16 = vand.u32 2147483647, %v296_v10  ;;  %v480_v8 = vmul.u32 %v2507_v54, %v464_v23  ;;  %vm482_vm11 = vc.u32 %v2535_v13, %v2538_v18  ;;  %v483_v5 = vadd.s32 1, %v2539_v26  ;;  %v85_v54 = vpop.permute.xlu1 %84 }
 0x12b   :  { %v602_v55 = vshll.u32 %v2520_v9, %v600_v25  ;;  %v603_v30 = vshrl.u32 %v585_v2, %v601_v31  ;;  %v606_v32 = vadd.s32 127, %v605_v15  ;;  %v747_v33 = vadd.s32 1, %v1872_v22 }
 0x12c   :  { %v484_v34 = vsel %vm482_vm11, %v483_v5, %v2539_v26  ;;  %v745_v36 = vor.u32 8388608, %v744_v27  ;;  %v633_v40 = vand.u32 2147483647, %v2497_v47  ;;  %v637_v42 = vshrl.u32 %v636_v4, 23 }
 0x12d   :  { %v604_v43 = vor.u32 %v603_v30, %v602_v55  ;;  %v607_v58 = vshll.u32 %v606_v32, 23  ;;  %v485_v49 = vadd.s32 %v484_v34, %v480_v8  ;;  %vm748_vm12 = vcmp.gt.s32.totalorder %v747_v33, 0 }
 0x12e   :  { %v403_v50 = vcvt.s32.f32 %v2516_v60  ;;  %v299_v57 = vcvt.s32.f32 %v292_v29  ;;  %v749_v63 = vsel %vm748_vm12, %v747_v33, 0  ;;  %v1868_v7 = vadd.s32 4294967169, %v637_v42 }
 0x12f   :  { %v608_v9 = vor.u32 4788187, %v607_v58  ;;  %v486_v2 = vadd.s32 536870912, %v485_v49  ;;  %v2557_v45 = vadd.f32 %v2359_v1, %v85_v54  ;;  %v751_v11 = vand.u32 31, %v749_v63 }
 0x130   :  { %v2559_v61 = vmul.f32 %v403_v50, %v401_v52  ;;  %v2561_v10 = vmul.f32 %v299_v57, %v297_v16  ;;  %v2563_v48 = vshll.u32 %v745_v36, 8  ;;  %v611_v26 = vcvt.s32.f32 %v604_v43 }
 0x131   :  { %v609_v53 = vand.u32 2147483647, %v608_v9  ;;  %v2565_v62 = vshrl.u32 %v486_v2, 30  ;;  %v640_v60 = vand.u32 8388607, %v633_v40  ;;  %v750_v23 = vshrl.u32 %v749_v63, 5 }
 0x132   :  { %v752_v24 = vsub.s32 32, %v751_v11  ;;  %v754_v25 = vshll.u32 %v2188_v12, %v751_v11  ;;  %v643_v1 = vadd.s32 1, %v1868_v7  ;;  %vm531_vm13 = vcmp.lt.s32.totalorder %v2343_v46, 0 }
 0x133   :  { %v612_v52 = vmul.f32 %v611_v26, %v609_v53  ;;  %v488_v27 = vshll.u32 %v2565_v62, 30  ;;  %v757_v4 = vshll.u32 %v2189_v14, %v751_v11  ;;  %v760_v29 = vshll.u32 %v2190_v17, %v751_v11 }
 0x134   :  { %v755_v31 = vshrl.u32 %v2189_v14, %v752_v24  ;;  %v758_v15 = vshrl.u32 %v2190_v17, %v752_v24  ;;  %v761_v22 = vshrl.u32 %v2191_v19, %v752_v24  ;;  %v763_v16 = vshll.u32 %v2191_v19, %v751_v11 }
 0x135   :  { %v2578_v8 = vsub.s32 %v485_v49, %v488_v27  ;;  %v764_v5 = vshrl.u32 %v2192_v21, %v752_v24  ;;  %v766_v55 = vshll.u32 %v2192_v21, %v751_v11  ;;  %v767_v30 = vshrl.u32 %v2193_v28, %v752_v24 }
 0x136   :  { %v756_v32 = vor.u32 %v755_v31, %v754_v25  ;;  %v759_v33 = vor.u32 %v758_v15, %v757_v4  ;;  %v762_v34 = vor.u32 %v761_v22, %v760_v29  ;;  %vm769_vm14 = vcmp.lt.s32.totalorder %v750_v23, 1 }
 0x137   :  { %vm2585_vm15 = vcmp.le.f32.partialorder %v529_v51, 0.7853982  ;;  %v491_v42 = vsub.s32 0, %v2578_v8  ;;  %v765_v43 = vor.u32 %v764_v5, %v763_v16  ;;  %v768_v58 = vor.u32 %v767_v30, %v766_v55 }
 0x138   :  { %vm770_vm0 = vcmp.lt.s32.totalorder %v750_v23, 2  ;;  %v613_v49 = vxor.u32 2147483648, %v612_v52  ;;  %v753_v54 = vshrl.u32 %v2188_v12, %v752_v24  ;;  %vm772_vm1 = vcmp.lt.s32.totalorder %v750_v23, 4 }
 0x139   :  { %v777_v50 = vsel %vm769_vm14, %v756_v32, %v759_v33  ;;  %v1861_v57 = vmin.u32 %v491_v42, %v2578_v8  ;;  %vm771_vm2 = vcmp.lt.s32.totalorder %v750_v23, 3  ;;  %v774_v63 = vsel %vm772_vm1, %v762_v34, 2102212464 }
 0x13a   :  { %v778_v7 = vsel %vm772_vm1, %v765_v43, 920167782  ;;  %v773_v51 = vsel %vm769_vm14, %v753_v54, %v756_v32  ;;  %v775_v9 = vsel %vm771_vm2, %v759_v33, %v774_v63  ;;  %v781_v11 = vsel %vm769_vm14, %v759_v33, %v762_v34 }
 0x13b   :  { %v779_v2 = vsel %vm771_vm2, %v762_v34, %v778_v7  ;;  %v493_v53 = vclz %v1861_v57  ;;  %v782_v25 = vsel %vm772_vm1, %v768_v58, 1326507024  ;;  %v641_v27 = vor.u32 8388608, %v640_v60 }
 0x13c   :  { %v780_v26 = vsel %vm770_vm0, %v777_v50, %v779_v2  ;;  %v614_v24 = vsel %vm531_vm13, %v613_v49, %v612_v52  ;;  %v783_v4 = vsel %vm771_vm2, %v765_v43, %v782_v25  ;;  %v776_v22 = vsel %vm770_vm0, %v773_v51, %v775_v9 }
 0x13d   :  { %v2599_v29 = vmul.u32.u64.low %v2563_v48, %v780_v26  ;;  %v2600_v31 = vmul.u32.u64.high %v2563_v48, %v780_v26, %v2599_v29  ;;  %v1862_v15 = vadd.s32 4294967294, %v493_v53  ;;  %v784_v16 = vsel %vm770_vm0, %v781_v11, %v783_v4 }
 0x13e   :  { %vm644_vm3 = vcmp.gt.s32.totalorder %v643_v1, 0  ;;  %v2606_v5 = vmul.u32.u64.low %v2563_v48, %v784_v16  ;;  %v2607_v55 = vmul.u32.u64.high %v2563_v48, %v784_v16, %v2606_v5  ;;  %v945_v30 = vand.u32 2147483647, %v2557_v45 }
 0x13f   :  { %v645_v60 = vsel %vm644_vm3, %v643_v1, 0  ;;  %v481_v52 = vadd.s32 %v2538_v18, %v2535_v13  ;;  %vm1863_vm4 = vcmp.lt.s32.totalorder %v1862_v15, 0  ;;  %v2612_v33 = vshll.u32 %v641_v27, 8 }
 0x140   :  { %v647_v32 = vand.u32 31, %v645_v60  ;;  %v2617_v23 = vsel %vm2585_vm15, %v2343_v46, %v614_v24  ;;  %v496_v34 = vsel %vm1863_vm4, 0, %v1862_v15  ;;  %v792_v42 = vmul.u32 %v2563_v48, %v776_v22 }
 0x141   :  { %v795_v43 = vadd.s32 1, %v2600_v31  ;;  %v497_v1 = vsub.s32 32, %v496_v34  ;;  %v501_v58 = vsub.s32 4294967266, %v496_v34  ;;  %v948_v54 = vand.u32 2139095040, %v2557_v45 }
 0x142   :  { %v648_v49 = vsub.s32 32, %v647_v32  ;;  %v498_v13 = vshll.u32 %v2578_v8, %v496_v34  ;;  %vm794_vm5 = vc.u32 %v2607_v55, %v2599_v29  ;;  %v2625_v18 = vshrl.u32 %v645_v60, 5 }
 0x143   :  { %v2629_v50 = vand.u32 8388607, %v945_v30  ;;  %v499_v57 = vshrl.u32 %v481_v52, %v497_v1  ;;  %v502_v48 = vadd.s32 127, %v501_v58  ;;  %v796_v63 = vsel %vm794_vm5, %v795_v43, %v2600_v31 }
 0x144   :  { %v650_v7 = vshll.u32 %v2188_v12, %v647_v32  ;;  %v797_v51 = vadd.s32 %v796_v63, %v792_v42  ;;  %v651_v9 = vshrl.u32 %v2189_v14, %v648_v49  ;;  %v653_v8 = vshll.u32 %v2189_v14, %v647_v32 }
 0x145   :  { %v654_v2 = vshrl.u32 %v2190_v17, %v648_v49  ;;  %v500_v11 = vor.u32 %v499_v57, %v498_v13  ;;  %v503_v53 = vshll.u32 %v502_v48, 23  ;;  %v656_v26 = vshll.u32 %v2190_v17, %v647_v32 }
 0x146   :  { %v657_v25 = vshrl.u32 %v2191_v19, %v648_v49  ;;  %v798_v27 = vadd.s32 536870912, %v797_v51  ;;  %v659_v24 = vshll.u32 %v2191_v19, %v647_v32  ;;  %v660_v4 = vshrl.u32 %v2192_v21, %v648_v49 }
 0x147   :  { %v949_v31 = vshrl.u32 %v948_v54, 23  ;;  %v504_v15 = vor.u32 4788187, %v503_v53  ;;  %v652_v22 = vor.u32 %v651_v9, %v650_v7  ;;  %v655_v16 = vor.u32 %v654_v2, %v653_v8 }
 0x148   :  { %v658_v5 = vor.u32 %v657_v25, %v656_v26  ;;  %v2640_v60 = vshrl.u32 %v798_v27, 30  ;;  %v661_v52 = vor.u32 %v660_v4, %v659_v24  ;;  %v662_v34 = vshll.u32 %v2192_v21, %v647_v32 }
 0x149   :  { %v663_v42 = vshrl.u32 %v2193_v28, %v648_v49  ;;  %v505_v43 = vand.u32 2147483647, %v504_v15  ;;  %v507_v1 = vcvt.s32.f32 %v500_v11  ;;  %v649_v58 = vshrl.u32 %v2188_v12, %v648_v49 }
 0x14a   :  { %vm668_vm6 = vcmp.lt.s32.totalorder %v2625_v18, 4  ;;  %vm427_vm7 = vcmp.lt.s32.totalorder %v2357_v0, 0  ;;  %v800_v54 = vshll.u32 %v2640_v60, 30  ;;  %vm665_vm8 = vcmp.lt.s32.totalorder %v2625_v18, 1 }
 0x14b   :  { %v664_v13 = vor.u32 %v663_v42, %v662_v34  ;;  %v670_v57 = vsel %vm668_vm6, %v658_v5, 2102212464  ;;  %v508_v48 = vmul.f32 %v507_v1, %v505_v43  ;;  %vm667_vm9 = vcmp.lt.s32.totalorder %v2625_v18, 3 }
 0x14c   :  { %v673_v32 = vsel %vm665_vm8, %v652_v22, %v655_v16  ;;  %v674_v63 = vsel %vm668_vm6, %v661_v52, 920167782  ;;  %v2654_v49 = vsub.s32 %v797_v51, %v800_v54  ;;  %vm666_vm10 = vcmp.lt.s32.totalorder %v2625_v18, 2  ;;  %v80_v51 = vpop.permute.xlu0 %79 }
 0x14d   :  { %v675_v7 = vsel %vm667_vm9, %v658_v5, %v674_v63  ;;  %v677_v9 = vsel %vm665_vm8, %v655_v16, %v658_v5  ;;  %vm2659_vm11 = vcmp.le.f32.partialorder %v425_v59, 0.7853982  ;;  %v669_v2 = vsel %vm665_vm8, %v649_v58, %v652_v22 }
 0x14e   :  { %v671_v11 = vsel %vm667_vm9, %v655_v16, %v670_v57  ;;  %v676_v53 = vsel %vm666_vm10, %v673_v32, %v675_v7  ;;  %v678_v26 = vsel %vm668_vm6, %v664_v13, 1326507024  ;;  %v803_v25 = vsub.s32 0, %v2654_v49 }
 0x14f   :  { %v679_v27 = vsel %vm667_vm9, %v661_v52, %v678_v26  ;;  %v2669_v24 = vmul.u32.u64.low %v2612_v33, %v676_v53  ;;  %v2670_v4 = vmul.u32.u64.high %v2612_v33, %v676_v53, %v2669_v24  ;;  %v509_v59 = vxor.u32 2147483648, %v508_v48 }
 0x150   :  { %v680_v15 = vsel %vm666_vm10, %v677_v9, %v679_v27  ;;  %v1880_v22 = vadd.s32 4294967169, %v949_v31  ;;  %v2676_v16 = vadd.f32 %v2363_v6, %v80_v51  ;;  %v405_v5 = vxor.u32 2147483648, %v2559_v61 }
 0x151   :  { %v1873_v34 = vmin.u32 %v803_v25, %v2654_v49  ;;  %v2681_v42 = vmul.u32.u64.low %v2612_v33, %v680_v15  ;;  %v2682_v52 = vmul.u32.u64.high %v2612_v33, %v680_v15, %v2681_v42  ;;  %2111 = vcosq.f32 %v2617_v23 }
 0x152   :  { %v672_v43 = vsel %vm666_vm10, %v669_v2, %v671_v11  ;;  %v953_v1 = vor.u32 8388608, %v2629_v50  ;;  %v955_v58 = vadd.s32 1, %v1880_v22  ;;  %v301_v31 = vxor.u32 2147483648, %v2561_v10 }
 0x153   :  { %2113 = vsinq.f32 %v2617_v23  ;;  %v805_v6 = vclz %v1873_v34  ;;  %v691_v54 = vadd.s32 1, %v2670_v4  ;;  %v510_v13 = vsel %vm427_vm7, %v509_v59, %v508_v48 }
 0x154   :  { %vm956_vm12 = vcmp.gt.s32.totalorder %v955_v58, 0  ;;  %v3425_v57 = vand.u32 2147483647, %v2676_v16  ;;  %v688_v18 = vmul.u32 %v2612_v33, %v672_v43  ;;  %vm690_vm14 = vc.u32 %v2682_v52, %v2669_v24 }
 0x155   :  { %v1874_v32 = vadd.s32 4294967294, %v805_v6  ;;  %v957_v50 = vsel %vm956_vm12, %v955_v58, 0  ;;  %v3426_v63 = vmov 0.0|0.0   ;;  %v793_v23 = vadd.s32 %v2599_v29, %v2607_v55 }
 0x156   :  { %2024 = vmatprep.subr.bf16.mxu1 %v3426_v63  ;;  %2037 = vmatprep.subr.bf16.mxu0 %v3426_v63  ;;  %v692_v48 = vsel %vm690_vm14, %v691_v54, %v2670_v4  ;;  %v959_v7 = vand.u32 31, %v957_v50  ;;  %v2702_v9 = vshll.u32 %v953_v1, 8  ;;  %v2707_v33 = vsel %vm2659_vm11, %v2357_v0, %v510_v13 }
 0x157   :  { %vm1875_vm0 = vcmp.lt.s32.totalorder %v1874_v32, 0  ;;  %v693_v2 = vadd.s32 %v692_v48, %v688_v18  ;;  %v844_v11 = vand.u32 2139095040, %v2676_v16  ;;  %v2710_v26 = vshrl.u32 %v957_v50, 5 }
 0x158   :  { %v808_v53 = vsel %vm1875_vm0, 0, %v1874_v32  ;;  %v960_v51 = vsub.s32 32, %v959_v7  ;;  %v2714_v29 = vand.u32 8388607, %v3425_v57  ;;  %v962_v4 = vshll.u32 %v2188_v12, %v959_v7 }
 0x159   :  { %v809_v55 = vsub.s32 32, %v808_v53  ;;  %v813_v25 = vsub.s32 4294967266, %v808_v53  ;;  %v694_v27 = vadd.s32 536870912, %v693_v2  ;;  %v810_v59 = vshll.u32 %v2654_v49, %v808_v53 }
 0x15a   :  { %v963_v15 = vshrl.u32 %v2189_v14, %v960_v51  ;;  %v965_v22 = vshll.u32 %v2189_v14, %v959_v7  ;;  %v966_v34 = vshrl.u32 %v2190_v17, %v960_v51  ;;  %v969_v58 = vshrl.u32 %v2191_v19, %v960_v51 }
 0x15b   :  { %v811_v42 = vshrl.u32 %v793_v23, %v809_v55  ;;  %v814_v43 = vadd.s32 127, %v813_v25  ;;  %v2721_v1 = vshrl.u32 %v694_v27, 30  ;;  %v2724_v6 = vpop.eup %2111  ;;  %v968_v13 = vshll.u32 %v2190_v17, %v959_v7 }
 0x15c   :  { %v964_v54 = vor.u32 %v963_v15, %v962_v4  ;;  %v971_v32 = vshll.u32 %v2191_v19, %v959_v7  ;;  %v972_v49 = vshrl.u32 %v2192_v21, %v960_v51  ;;  %v967_v53 = vor.u32 %v966_v34, %v965_v22 }
 0x15d   :  { %v2729_v18 = vpop.eup %2113  ;;  %v812_v50 = vor.u32 %v811_v42, %v810_v59  ;;  %v815_v48 = vshll.u32 %v814_v43, 23  ;;  %v696_v23 = vshll.u32 %v2721_v1, 30  ;;  %v970_v55 = vor.u32 %v969_v58, %v968_v13 }
 0x15e   :  { %v973_v25 = vor.u32 %v972_v49, %v971_v32  ;;  %v974_v27 = vshll.u32 %v2192_v21, %v959_v7  ;;  %v975_v57 = vshrl.u32 %v2193_v28, %v960_v51  ;;  %vm323_vm1 = vcmp.lt.s32.totalorder %v2333_v35, 0 }
 0x15f   :  { %vm219_vm2 = vcmp.lt.s32.totalorder %v2335_v37, 0  ;;  %v816_v4 = vor.u32 4788187, %v815_v48  ;;  %v2736_v15 = vsub.s32 %v693_v2, %v696_v23  ;;  %v961_v63 = vshrl.u32 %v2188_v12, %v960_v51 }
 0x160   :  { %v845_v59 = vshrl.u32 %v844_v11, 23  ;;  %v819_v42 = vcvt.s32.f32 %v812_v50  ;;  %v976_v43 = vor.u32 %v975_v57, %v974_v27  ;;  %vm977_vm3 = vcmp.lt.s32.totalorder %v2710_v26, 1 }
 0x161   :  { %vm979_vm4 = vcmp.lt.s32.totalorder %v2710_v26, 3  ;;  %v817_v22 = vand.u32 2147483647, %v816_v4  ;;  %v699_v7 = vsub.s32 0, %v2736_v15  ;;  %vm980_vm5 = vcmp.lt.s32.totalorder %v2710_v26, 4 }
 0x162   :  { %v985_v34 = vsel %vm977_vm3, %v964_v54, %v967_v53  ;;  %vm739_vm6 = vcmp.lt.s32.totalorder %v2494_v44, 0  ;;  %v982_v2 = vsel %vm980_vm5, %v970_v55, 2102212464  ;;  %v986_v58 = vsel %vm980_vm5, %v973_v25, 920167782 }
 0x163   :  { %v989_v11 = vsel %vm977_vm3, %v967_v53, %v970_v55  ;;  %v990_v57 = vsel %vm980_vm5, %v976_v43, 1326507024  ;;  %v820_v51 = vmul.f32 %v819_v42, %v817_v22  ;;  %v1869_v13 = vmin.u32 %v699_v7, %v2736_v15 }
 0x164   :  { %vm978_vm8 = vcmp.lt.s32.totalorder %v2710_v26, 2  ;;  %v987_v32 = vsel %vm979_vm4, %v970_v55, %v986_v58  ;;  %vm2754_vm9 = vcmp.le.f32.partialorder %v217_v41, 0.7853982  ;;  %v991_v48 = vsel %vm979_vm4, %v973_v25, %v990_v57 }
 0x165   :  { %v988_v50 = vsel %vm978_vm8, %v985_v34, %v987_v32  ;;  %v1876_v23 = vadd.s32 4294967169, %v845_v59  ;;  %v303_v27 = vsub.s32 4, %v2467_v39  ;;  %v701_v4 = vclz %v1869_v13 }
 0x166   :  { %v981_v42 = vsel %vm977_vm3, %v961_v63, %v964_v54  ;;  %v983_v55 = vsel %vm979_vm4, %v967_v53, %v982_v2  ;;  %v992_v41 = vsel %vm978_vm8, %v989_v11, %v991_v48  ;;  %2115 = vcosq.f32 %v2707_v33 }
 0x167   :  { %v2770_v43 = vmul.u32.u64.low %v2702_v9, %v992_v41  ;;  %v2771_v22 = vmul.u32.u64.high %v2702_v9, %v992_v41, %v2770_v43  ;;  %v2774_v7 = vmul.u32.u64.low %v2702_v9, %v988_v50  ;;  %v2775_v25 = vmul.u32.u64.high %v2702_v9, %v988_v50, %v2774_v7 }
 0x168   :  { %v821_v59 = vxor.u32 2147483648, %v820_v51  ;;  %v1870_v34 = vadd.s32 4294967294, %v701_v4  ;;  %v851_v63 = vadd.s32 1, %v1876_v23  ;;  %v2784_v54 = vsel %vm323_vm1, %v405_v5, %v2559_v61 }
 0x169   :  { %v302_v53 = vsel %vm219_vm2, %v301_v31, %v2561_v10  ;;  %2117 = vsinq.f32 %v2707_v33  ;;  %vm2794_vm10 = vcmp.le.f32.partialorder %v737_v20, 0.7853982  ;;  %v984_v58 = vsel %vm978_vm8, %v981_v42, %v983_v55 }
 0x16a   :  { %vm1871_vm12 = vcmp.lt.s32.totalorder %v1870_v34, 0  ;;  %vm852_vm14 = vcmp.gt.s32.totalorder %v851_v63, 0  ;;  %v304_v61 = vsel %vm219_vm2, %v303_v27, %v2467_v39  ;;  %v689_v10 = vadd.s32 %v2669_v24, %v2682_v52 }
 0x16b   :  { %v704_v5 = vsel %vm1871_vm12, 0, %v1870_v34  ;;  %vm1002_vm0 = vc.u32 %v2771_v22, %v2774_v7  ;;  %v849_v20 = vor.u32 8388608, %v2714_v29  ;;  %v822_v31 = vsel %vm739_vm6, %v821_v59, %v820_v51 }
 0x16c   :  { %v705_v33 = vsub.s32 32, %v704_v5  ;;  %v709_v26 = vsub.s32 4294967266, %v704_v5  ;;  %v1003_v11 = vadd.s32 1, %v2775_v25  ;;  %v1000_v57 = vmul.u32 %v2702_v9, %v984_v58 }
 0x16d   :  { %v853_v13 = vsel %vm852_vm14, %v851_v63, 0  ;;  %v305_v39 = vsel %vm2754_vm9, %v2335_v37, %v302_v53  ;;  %v306_v24 = vsel %vm2754_vm9, 0, %v304_v61  ;;  %v706_v52 = vshll.u32 %v2736_v15, %v704_v5 }
 0x16e   :  { %v707_v29 = vshrl.u32 %v689_v10, %v705_v33  ;;  %v710_v32 = vadd.s32 127, %v709_v26  ;;  %v1004_v51 = vsel %vm1002_vm0, %v1003_v11, %v2775_v25  ;;  %v2822_v50 = vsel %vm2794_vm10, %v2494_v44, %v822_v31 }
 0x16f   :  { %v1005_v9 = vadd.s32 %v1004_v51, %v1000_v57  ;;  %v855_v48 = vand.u32 31, %v853_v13  ;;  %v407_v23 = vsub.s32 4, %v2439_v56  ;;  %2119 = vcosq.f32 %v305_v39 }
 0x170   :  { %v708_v27 = vor.u32 %v707_v29, %v706_v52  ;;  %v711_v4 = vshll.u32 %v710_v32, 23  ;;  %v310_v49 = vadd.s32 3, %v306_v24  ;;  %v2825_v55 = vshrl.u32 %v853_v13, 5  ;;  %v2827_v41 = vpop.eup %2115 }
 0x171   :  { %v1006_v42 = vadd.s32 536870912, %v1005_v9  ;;  %v856_v15 = vsub.s32 32, %v855_v48  ;;  %2121 = vsinq.f32 %v305_v39  ;;  %v858_v59 = vshll.u32 %v2188_v12, %v855_v48 }
 0x172   :  { %v712_v43 = vor.u32 4788187, %v711_v4  ;;  %v715_v25 = vcvt.s32.f32 %v708_v27  ;;  %v861_v34 = vshll.u32 %v2189_v14, %v855_v48  ;;  %v864_v10 = vshll.u32 %v2190_v17, %v855_v48 }
 0x173   :  { %v2831_v63 = vpop.eup %2117  ;;  %v2833_v53 = vshrl.u32 %v1006_v42, 30  ;;  %v859_v58 = vshrl.u32 %v2189_v14, %v856_v15  ;;  %v862_v61 = vshrl.u32 %v2190_v17, %v856_v15  ;;  %vm635_vm2 = vcmp.lt.s32.totalorder %v2497_v47, 0 }
 0x174   :  { %v713_v5 = vand.u32 2147483647, %v712_v43  ;;  %v865_v31 = vshrl.u32 %v2191_v19, %v856_v15  ;;  %v867_v33 = vshll.u32 %v2191_v19, %v855_v48  ;;  %v868_v26 = vshrl.u32 %v2192_v21, %v856_v15 }
 0x175   :  { %v1008_v11 = vshll.u32 %v2833_v53, 30  ;;  %v860_v57 = vor.u32 %v859_v58, %v858_v59  ;;  %v863_v13 = vor.u32 %v862_v61, %v861_v34  ;;  %v870_v39 = vshll.u32 %v2192_v21, %v855_v48 }
 0x176   :  { %v716_v24 = vmul.f32 %v715_v25, %v713_v5  ;;  %v866_v52 = vor.u32 %v865_v31, %v864_v10  ;;  %v869_v29 = vor.u32 %v868_v26, %v867_v33  ;;  %v871_v32 = vshrl.u32 %v2193_v28, %v856_v15 }
 0x177   :  { %2123 = vcosq.f32 %v2822_v50  ;;  %v1001_v51 = vadd.s32 %v2774_v7, %v2771_v22  ;;  %v2848_v27 = vsub.s32 %v1005_v9, %v1008_v11  ;;  %v2850_v4 = vshll.u32 %v849_v20, 8 }
 0x178   :  { %vm2854_vm3 = vcmp.le.f32.partialorder %v321_v38, 0.7853982  ;;  %v872_v48 = vor.u32 %v871_v32, %v870_v39  ;;  %vm873_vm4 = vcmp.lt.s32.totalorder %v2825_v55, 1  ;;  %vm876_vm5 = vcmp.lt.s32.totalorder %v2825_v55, 4 }
 0x179   :  { %v311_v43 = vand.u32 3, %v310_v49  ;;  %v717_v25 = vxor.u32 2147483648, %v716_v24  ;;  %v1011_v59 = vsub.s32 0, %v2848_v27  ;;  %v878_v22 = vsel %vm876_vm5, %v866_v52, 2102212464  ;;  %v2120_v20 = vpop.eup %2119 }
 0x17a   :  { %v881_v7 = vsel %vm873_vm4, %v860_v57, %v863_v13  ;;  %v857_v38 = vshrl.u32 %v2188_v12, %v856_v15  ;;  %vm875_vm8 = vcmp.lt.s32.totalorder %v2825_v55, 3  ;;  %v882_v9 = vsel %vm876_vm5, %v869_v29, 920167782 }
 0x17b   :  { %v408_v49 = vsel %vm323_vm1, %v407_v23, %v2439_v56  ;;  %v2122_v34 = vpop.eup %2121  ;;  %vm2874_vm9 = vcmp.le.f32.partialorder %v633_v40, 0.7853982  ;;  %v1881_v61 = vmin.u32 %v1011_v59, %v2848_v27  ;;  %vm874_vm12 = vcmp.lt.s32.totalorder %v2825_v55, 2 }
 0x17c   :  { %v883_v15 = vsel %vm875_vm8, %v866_v52, %v882_v9  ;;  %v885_v10 = vsel %vm873_vm4, %v863_v13, %v866_v52  ;;  %v877_v5 = vsel %vm873_vm4, %v857_v38, %v860_v57  ;;  %v879_v31 = vsel %vm875_vm8, %v863_v13, %v878_v22 }
 0x17d   :  { %v884_v56 = vsel %vm874_vm12, %v881_v7, %v883_v15  ;;  %v886_v23 = vsel %vm876_vm5, %v872_v48, 1326507024  ;;  %v718_v40 = vsel %vm635_vm2, %v717_v25, %v716_v24  ;;  %v1013_v33 = vclz %v1881_v61 }
 0x17e   :  { %v887_v26 = vsel %vm875_vm8, %v869_v29, %v886_v23  ;;  %vm312_vm1 = vcmp.lt.s32.totalorder %v311_v43, 2  ;;  %v2889_v39 = vmul.u32.u64.low %v2850_v4, %v884_v56  ;;  %v2890_v32 = vmul.u32.u64.high %v2850_v4, %v884_v56, %v2889_v39 }
 0x17f   :  { %v888_v11 = vsel %vm874_vm12, %v885_v10, %v887_v26  ;;  %v314_v52 = vxor.u32 2147483648, %v2122_v34  ;;  %v1882_v59 = vadd.s32 4294967294, %v1013_v33  ;;  %v880_v57 = vsel %vm874_vm12, %v877_v5, %v879_v31 }
 0x180   :  { %v2894_v13 = vmul.u32.u64.low %v2850_v4, %v888_v11  ;;  %v2895_v22 = vmul.u32.u64.high %v2850_v4, %v888_v11, %v2894_v13  ;;  %vm313_vm14 = vcmp.eq.s32.totalorder %v311_v43, 0  ;;  %v317_v55 = vxor.u32 2147483648, %v2120_v20 }
 0x181   :  { %v409_v24 = vsel %vm2854_vm3, %v2333_v35, %v2784_v54  ;;  %v410_v29 = vsel %vm2854_vm3, 0, %v408_v49  ;;  %v2903_v48 = vpop.eup %2123  ;;  %vm1883_vm0 = vcmp.lt.s32.totalorder %v1882_v59, 0  ;;  %vm316_vm4 = vcmp.eq.s32.totalorder %v311_v43, 2 }
 0x182   :  { %2125 = vcosq.f32 %v409_v24  ;;  %v511_v25 = vsub.s32 4, %v2565_v62  ;;  %v1016_v7 = vsel %vm1883_vm0, 0, %v1882_v59  ;;  %v899_v38 = vadd.s32 1, %v2890_v32 }
 0x183   :  { %v315_v9 = vsel %vm313_vm14, %v2120_v20, %v314_v52  ;;  %2127 = vsinq.f32 %v409_v24  ;;  %v1017_v61 = vsub.s32 32, %v1016_v7  ;;  %v1021_v15 = vsub.s32 4294967266, %v1016_v7 }
 0x184   :  { %v318_v10 = vsel %vm316_vm4, %v317_v55, %v2122_v34  ;;  %v414_v5 = vadd.s32 3, %v410_v29  ;;  %v721_v54 = vsel %vm2874_vm9, %v2497_v47, %v718_v40  ;;  %v896_v42 = vmul.u32 %v2850_v4, %v880_v57 }
 0x185   :  { %vm898_vm3 = vc.u32 %v2895_v22, %v2889_v39  ;;  %v512_v49 = vsel %vm427_vm7, %v511_v25, %v2565_v62  ;;  %v1018_v20 = vshll.u32 %v2848_v27, %v1016_v7  ;;  %v1019_v31 = vshrl.u32 %v1001_v51, %v1017_v61 }
 0x186   :  { %v1022_v56 = vadd.s32 127, %v1021_v15  ;;  %v900_v34 = vsel %vm898_vm3, %v899_v38, %v2890_v32  ;;  %2129 = vsinq.f32 %v2822_v50  ;;  %v319_v40 = vsel %vm312_vm1, %v315_v9, %v318_v10 }
 0x187   :  { %v901_v23 = vadd.s32 %v900_v34, %v896_v42  ;;  %v1020_v33 = vor.u32 %v1019_v31, %v1018_v20  ;;  %v415_v26 = vand.u32 3, %v414_v5  ;;  %v514_v11 = vsel %vm2659_vm11, 0, %v512_v49 }
 0x188   :  { %v1023_v4 = vshll.u32 %v1022_v56, 23  ;;  %2131 = vsinq.f32 %v721_v54  ;;  %vm309_vm7 = vweird.f32 %v2335_v37  ;;  %vm413_vm5 = vweird.f32 %v2333_v35 }
 0x189   :  { %v902_v52 = vadd.s32 536870912, %v901_v23  ;;  %v518_v62 = vadd.s32 3, %v514_v11  ;;  %2133 = vcosq.f32 %v721_v54  ;;  %vm947_vm8 = vcmp.lt.s32.totalorder %v2557_v45, 0 }
 0x18a   :  { %v1024_v50 = vor.u32 4788187, %v1023_v4  ;;  %v615_v51 = vsub.s32 4, %v2505_v3  ;;  %v320_v43 = vsel %vm309_vm7, nan, %v319_v40  ;;  %v522_v8 = vxor.u32 2147483648, %v2831_v63 }
 0x18b   :  { %v2926_v27 = vshrl.u32 %v902_v52, 30  ;;  %v519_v32 = vand.u32 3, %v518_v62  ;;  %v1027_v13 = vcvt.s32.f32 %v1020_v33  ;;  %vm416_vm11 = vcmp.lt.s32.totalorder %v415_v26, 2 }
 0x18c   :  { %v2126_v59 = vpop.eup %2125  ;;  %v1025_v57 = vand.u32 2147483647, %v1024_v50  ;;  %v525_v37 = vxor.u32 2147483648, %v2827_v41  ;;  %vm2932_vm12 = vcmp.le.f32.partialorder %v945_v30, 0.7853982  ;;  %vm417_vm1 = vcmp.eq.s32.totalorder %v415_v26, 0 }
 0x18d   :  { %v2128_v55 = vpop.eup %2127  ;;  %v904_v29 = vshll.u32 %v2926_v27, 30  ;;  %vm420_vm14 = vcmp.eq.s32.totalorder %v415_v26, 2  ;;  %v421_v25 = vxor.u32 2147483648, %v2126_v59  ;;  %vm521_vm0 = vcmp.eq.s32.totalorder %v519_v32, 0 }
 0x18e   :  { %v1028_v7 = vmul.f32 %v1027_v13, %v1025_v57  ;;  %v418_v38 = vxor.u32 2147483648, %v2128_v55  ;;  %v616_v9 = vsel %vm531_vm13, %v615_v51, %v2505_v3  ;;  %v523_v30 = vsel %vm521_vm0, %v2827_v41, %v522_v8 }
 0x18f   :  { %v2940_v61 = vsub.s32 %v901_v23, %v904_v29  ;;  %v422_v15 = vsel %vm420_vm14, %v421_v25, %v2128_v55  ;;  %vm524_vm4 = vcmp.eq.s32.totalorder %v519_v32, 2  ;;  %v719_v42 = vsub.s32 4, %v2721_v1 }
 0x190   :  { %v1029_v10 = vxor.u32 2147483648, %v1028_v7  ;;  %v419_v5 = vsel %vm417_vm1, %v2126_v59, %v418_v38  ;;  %v526_v54 = vsel %vm524_vm4, %v525_v37, %v2831_v63  ;;  %v2945_v49 = vpop.eup %2129  ;;  %v897_v20 = vadd.s32 %v2889_v39, %v2895_v22 }
 0x191   :  { %v907_v31 = vsub.s32 0, %v2940_v61  ;;  %v423_v3 = vsel %vm416_vm11, %v419_v5, %v422_v15  ;;  %vm520_vm13 = vcmp.lt.s32.totalorder %v519_v32, 2  ;;  %vm517_vm3 = vweird.f32 %v2357_v0 }
 0x192   :  { %v424_v41 = vsel %vm413_vm5, nan, %v423_v3  ;;  %v527_v56 = vsel %vm520_vm13, %v523_v30, %v526_v54  ;;  %v618_v63 = vsel %vm2585_vm15, 0, %v616_v9  ;;  %v2132_v34 = vpop.eup %2131  ;;  %v1030_v23 = vsel %vm947_vm8, %v1029_v10, %v1028_v7 }
 0x193   :  { %v1877_v39 = vmin.u32 %v907_v31, %v2940_v61  ;;  %v2025_v22 = vpack.c.bf16 %v424_v41, %v320_v43  ;;  %v622_v40 = vadd.s32 3, %v618_v63  ;;  %v2134_v33 = vpop.eup %2133  ;;  %vm621_vm7 = vweird.f32 %v2343_v46 }
 0x194   :  { %v626_v35 = vxor.u32 2147483648, %v2729_v18  ;;  %v629_v4 = vxor.u32 2147483648, %v2724_v6  ;;  %v720_v0 = vsel %vm635_vm2, %v719_v42, %v2721_v1  ;;  %v528_v26 = vsel %vm517_vm3, nan, %v527_v56 }
 0x195   :  { %v909_v36 = vclz %v1877_v39  ;;  %2026 = vmatpush3.bf16.msra.mxu1 %v2025_v22  ;;  %v623_v11 = vand.u32 3, %v622_v40  ;;  %v722_v52 = vsel %vm2874_vm9, 0, %v720_v0  ;;  %v1033_v62 = vsel %vm2932_vm12, %v2557_v45, %v1030_v23 }
 0x196   :  { %v3442_v50 = vmov 0.0|0.0   ;;  %v726_v51 = vadd.s32 3, %v722_v52  ;;  %v730_v43 = vxor.u32 2147483648, %v2132_v34  ;;  %v823_v32 = vsub.s32 4, %v2640_v60 }
 0x197   :  { %2027 = vmatprep.subr.bf16.mxu1 %v3442_v50  ;;  %v1878_v8 = vadd.s32 4294967294, %v909_v36  ;;  %vm624_vm15 = vcmp.lt.s32.totalorder %v623_v11, 2  ;;  %vm625_vm2 = vcmp.eq.s32.totalorder %v623_v11, 0  ;;  %vm628_vm5 = vcmp.eq.s32.totalorder %v623_v11, 2 }
 0x198   :  { %v627_v1 = vsel %vm625_vm2, %v2724_v6, %v626_v35  ;;  %v630_v59 = vsel %vm628_vm5, %v629_v4, %v2729_v18  ;;  %v727_v58 = vand.u32 3, %v726_v51  ;;  %v824_v57 = vsel %vm739_vm6, %v823_v32, %v2640_v60 }
 0x199   :  { %vm1879_vm9 = vcmp.lt.s32.totalorder %v1878_v8, 0  ;;  %v631_v13 = vsel %vm624_vm15, %v627_v1, %v630_v59  ;;  %v733_v37 = vxor.u32 2147483648, %v2134_v33  ;;  %v826_v55 = vsel %vm2794_vm10, 0, %v824_v57 }
 0x19a   :  { %v912_v29 = vsel %vm1879_vm9, 0, %v1878_v8  ;;  %v632_v25 = vsel %vm621_vm7, nan, %v631_v13  ;;  %v834_v7 = vxor.u32 2147483648, %v2945_v49  ;;  %v837_v6 = vxor.u32 2147483648, %v2903_v48 }
 0x19b   :  { %v913_v18 = vsub.s32 32, %v912_v29  ;;  %v917_v38 = vsub.s32 4294967266, %v912_v29  ;;  %v2028_v9 = vpack.c.bf16 %v632_v25, %v528_v26  ;;  %vm729_vm11 = vcmp.eq.s32.totalorder %v727_v58, 0 }
 0x19c   :  { %vm728_vm1 = vcmp.lt.s32.totalorder %v727_v58, 2  ;;  %v731_v60 = vsel %vm729_vm11, %v2134_v33, %v730_v43  ;;  %vm732_vm6 = vcmp.eq.s32.totalorder %v727_v58, 2  ;;  %v830_v15 = vadd.s32 3, %v826_v55 }
 0x19d   :  { %v914_v30 = vshll.u32 %v2940_v61, %v912_v29  ;;  %v915_v2 = vshrl.u32 %v897_v20, %v913_v18  ;;  %v918_v10 = vadd.s32 127, %v917_v38  ;;  %2029 = vmatpush3.bf16.msra.mxu1 %v2028_v9  ;;  %v734_v5 = vsel %vm732_vm6, %v733_v37, %v2132_v34  ;;  %v1049_v18 = vld [vmem:[%s3420_s3] sm:$0xff]  ;;  %v1052_v38 = vld [vmem:[%s3420_s3 + $0x18] sm:$0xff] }
 0x19e   :  { %2030 = vmatprep.subr.bf16.mxu1 %v3442_v50  ;;  %v735_v46 = vsel %vm728_vm1, %v731_v60, %v734_v5  ;;  %v831_v54 = vand.u32 3, %v830_v15  ;;  %v1031_v42 = vsub.s32 4, %v2833_v53  ;;  %vm725_vm10 = vweird.f32 %v2497_v47  ;;  %v1053_v9 = vld [vmem:[%s3420_s3 + $0x20] sm:$0xff]  ;;  %v1062_v60 = vpop.permute.xlu0 %1061 }
 0x19f   :  { %v916_v31 = vor.u32 %v915_v2, %v914_v30  ;;  %v919_v3 = vshll.u32 %v918_v10, 23  ;;  %2135 = vcosq.f32 %v1033_v62  ;;  %v736_v41 = vsel %vm725_vm10, nan, %v735_v46  ;;  %v1067_v46 = vpop.permute.xlu1 %1066 }
 0x1a0   :  { %vm833_vm14 = vcmp.eq.s32.totalorder %v831_v54, 0  ;;  %vm836_vm0 = vcmp.eq.s32.totalorder %v831_v54, 2  ;;  %vm832_vm4 = vcmp.lt.s32.totalorder %v831_v54, 2  ;;  %2137 = vsinq.f32 %v1033_v62 }
 0x1a1   :  { %v920_v56 = vor.u32 4788187, %v919_v3  ;;  %v835_v61 = vsel %vm833_vm14, %v2903_v48, %v834_v7  ;;  %v838_v20 = vsel %vm836_vm0, %v837_v6, %v2945_v49  ;;  %vm829_vm13 = vweird.f32 %v2494_v44 }
 0x1a2   :  { %v839_v63 = vsel %vm832_vm4, %v835_v61, %v838_v20  ;;  %v923_v23 = vcvt.s32.f32 %v916_v31  ;;  %v1032_v47 = vsel %vm947_vm8, %v1031_v42, %v2833_v53  ;;  %v927_v33 = vsub.s32 4, %v2926_v27 }
 0x1a3   :  { %v921_v34 = vand.u32 2147483647, %v920_v56  ;;  %v840_v39 = vsel %vm829_vm13, nan, %v839_v63  ;;  %vm2195_vm3 = vmmov 0   ;;  %v2196_v48 = vmov 0.0  }
 0x1a4   :  { %v2031_v22 = vpack.c.bf16 %v840_v39, %v736_v41  ;;  %1982 = vmatprep.mubr.msk.f32.mxu1 %vm2195_vm3, %v2196_v48  ;;  %v1034_v44 = vsel %vm2932_vm12, 0, %v1032_v47  ;;  %2007 = vmatprep.mubr.msk.f32.mxu0 %vm2195_vm3, %v2196_v48  ;;  %vm843_vm8 = vcmp.lt.s32.totalorder %v2676_v16, 0  ;;  %v3443_v53 = vand.u32 2147483647, %v2676_v16 }
 0x1a5   :  { %v924_v40 = vmul.f32 %v923_v23, %v921_v34  ;;  %v928_v4 = vsel %vm843_vm8, %v927_v33, %v2926_v27  ;;  %v1038_v36 = vadd.s32 3, %v1034_v44  ;;  %vm1037_vm9 = vweird.f32 %v2557_v45  ;;  %v1050_v45 = vld [vmem:[%s3420_s3 + $0x8] sm:$0xff]  ;;  %v1072_v34 = vpop.permute.xlu0 %1071 }
 0x1a6   :  { %2032 = vmatpush3.bf16.msra.mxu1 %v2031_v22  ;;  %vm842_vm7 = vcmp.le.f32.partialorder %v3443_v53, 0.7853982  ;;  %vm1100_vm1 = vcmask 1043456   ;;  %vm933_vm10 = vweird.f32 %v2676_v16  ;;  %vm2197_vm14 = vmmov 1  }
 0x1a7   :  { %v925_v49 = vxor.u32 2147483648, %v924_v40  ;;  %2033 = vmatprep.subr.bf16.mxu1 %v3442_v50  ;;  %v930_v11 = vsel %vm842_vm7, 0, %v928_v4  ;;  %v1039_v52 = vand.u32 3, %v1038_v36  ;;  %vm2035_vm0 = vmpackc.low %vm1100_vm1, %vm2197_vm14  ;;  %vm1084_vm4 = vcmask 490496  }
 0x1a8   :  { %v934_v62 = vadd.s32 3, %v930_v11 }
 0x1a9   :  { %v926_v35 = vsel %vm843_vm8, %v925_v49, %v924_v40  ;;  %v2136_v0 = vpop.eup %2135  ;;  %vm1041_vm12 = vcmp.eq.s32.totalorder %v1039_v52, 0  ;;  %vm1044_vm15 = vcmp.eq.s32.totalorder %v1039_v52, 2  ;;  %vm1040_vm2 = vcmp.lt.s32.totalorder %v1039_v52, 2 }
 0x1aa   :  { %v929_v26 = vsel %vm842_vm7, %v2676_v16, %v926_v35  ;;  %v2138_v24 = vpop.eup %2137  ;;  %v1045_v43 = vxor.u32 2147483648, %v2136_v0  ;;  %v935_v32 = vand.u32 3, %v934_v62  ;;  %v1051_v16 = vld [vmem:[%s3420_s3 + $0x10] sm:$0xff] }
 0x1ab   :  { %2139 = vcosq.f32 %v929_v26  ;;  %v1042_v51 = vxor.u32 2147483648, %v2138_v24 }
 0x1ac   :  { %2141 = vsinq.f32 %v929_v26  ;;  %v1046_v1 = vsel %vm1044_vm15, %v1045_v43, %v2138_v24  ;;  %vm940_vm5 = vcmp.eq.s32.totalorder %v935_v32, 2  ;;  %vm937_vm11 = vcmp.eq.s32.totalorder %v935_v32, 0 }
 0x1ad   :  { %v1043_v8 = vsel %vm1041_vm12, %v2136_v0, %v1042_v51  ;;  %vm936_vm6 = vcmp.lt.s32.totalorder %v935_v32, 2 }
 0x1ae   :  { %v1047_v57 = vsel %vm1040_vm2, %v1043_v8, %v1046_v1 }
 0x1af   :  { %v1048_v29 = vsel %vm1037_vm9, nan, %v1047_v57 }
 0x1b5   :  { %v2140_v59 = vpop.eup %2139 }
 0x1b6   :  { %v2142_v27 = vpop.eup %2141  ;;  %v941_v58 = vxor.u32 2147483648, %v2140_v59 }
 0x1b7   :  { %v938_v13 = vxor.u32 2147483648, %v2142_v27 }
 0x1b8   :  { %v942_v37 = vsel %vm940_vm5, %v941_v58, %v2142_v27 }
 0x1b9   :  { %v939_v55 = vsel %vm937_vm11, %v2140_v59, %v938_v13 }
 0x1ba   :  { %v943_v25 = vsel %vm936_vm6, %v939_v55, %v942_v37 }
 0x1bb   :  { %v944_v7 = vsel %vm933_vm10, nan, %v943_v25 }
 0x1bc   :  { %v2034_v6 = vpack.c.bf16 %v1048_v29, %v944_v7 }
 0x1be   :  { %2036 = vmatpush3.bf16.msk.msra.mxu1 %vm2035_vm0, %v2034_v6 }
 0x1c1   :  { %1983 = vmatmul.mubr.msk.f32.vlgmr.msra.gmra.mrb[0].mxu1 %vm1084_vm4, %v1049_v18 }
 0x1c2   :  { %1985 = vmatprep.mubr.msk.f32.mxu1 %vm2195_vm3, %v2196_v48 }
 0x1c5   :  { %1986 = vmatmul.mubr.msk.f32.gmra.mrb[2].mxu1 %vm1084_vm4, %v1050_v45 }
 0x1c6   :  { %1988 = vmatprep.mubr.msk.f32.mxu1 %vm2195_vm3, %v2196_v48 }
 0x1c9   :  { %1989 = vmatmul.mubr.msk.f32.gmra.mrb[4].mxu1 %vm1084_vm4, %v1051_v16 }
 0x1ca   :  { %1991 = vmatprep.mubr.msk.f32.mxu1 %vm2195_vm3, %v2196_v48 }
 0x1cd   :  { %1992 = vmatmul.mubr.msk.f32.gmra.mrb[6].mxu1 %vm1084_vm4, %v1052_v38 }
 0x1ce   :  { %1994 = vmatprep.mubr.msk.f32.mxu1 %vm2195_vm3, %v2196_v48 }
 0x1d1   :  { %1995 = vmatmul.mubr.msk.f32.gmra.mrb[8].mxu1 %vm1084_vm4, %v1053_v9 }
 0x294   :  { %v1170_v15 = vpop.f32.mrb[0].mxu1 }
 0x295   :  { %v3031_v30 = vadd.f32 %v1170_v15, %v1062_v60  ;;  %v1984_v2 = vpop.f32.mrb[1].mxu1 }
 0x297   :  { %v1194_v10 = vand.u32 2147483647, %v3031_v30  ;;  %v1197_v5 = vand.u32 2139095040, %v3031_v30 }
 0x298   :  { %v1175_v54 = vpop.f32.mrb[2].mxu1 }
 0x299   :  { %v1198_v42 = vshrl.u32 %v1197_v5, 23  ;;  %v3035_v31 = vadd.f32 %v1175_v54, %v1067_v46  ;;  %v1987_v3 = vpop.f32.mrb[3].mxu1  ;;  %v1201_v41 = vand.u32 8388607, %v1194_v10 }
 0x29b   :  { %v1890_v56 = vadd.s32 4294967169, %v1198_v42  ;;  %v1298_v61 = vand.u32 2147483647, %v3035_v31  ;;  %v1301_v20 = vand.u32 2139095040, %v3035_v31  ;;  %v1202_v39 = vor.u32 8388608, %v1201_v41 }
 0x29c   :  { %v1180_v63 = vpop.f32.mrb[4].mxu1 }
 0x29d   :  { %v1204_v23 = vadd.s32 1, %v1890_v56  ;;  %v1302_v47 = vshrl.u32 %v1301_v20, 23  ;;  %v1305_v22 = vand.u32 8388607, %v1298_v61  ;;  %v3043_v40 = vadd.f32 %v1180_v63, %v1072_v34  ;;  %v1990_v33 = vpop.f32.mrb[5].mxu1 }
 0x29e   :  { %v3047_v36 = vshll.u32 %v1202_v39, 8 }
 0x29f   :  { %vm1205_vm13 = vcmp.gt.s32.totalorder %v1204_v23, 0  ;;  %v1894_v49 = vadd.s32 4294967169, %v1302_v47  ;;  %v1306_v26 = vor.u32 8388608, %v1305_v22  ;;  %v1402_v24 = vand.u32 2147483647, %v3043_v40 }
 0x2a0   :  { %v1206_v44 = vsel %vm1205_vm13, %v1204_v23, 0  ;;  %v3045_v53 = vpop.f32.mrb[6].mxu1  ;;  %v1405_v11 = vand.u32 2139095040, %v3043_v40 }
 0x2a1   :  { %v1207_v35 = vshrl.u32 %v1206_v44, 5  ;;  %v1208_v4 = vand.u32 31, %v1206_v44  ;;  %v1993_v0 = vpop.f32.mrb[7].mxu1  ;;  %v1308_v43 = vadd.s32 1, %v1894_v49  ;;  %v3073_v34 = vshll.u32 %v1306_v26, 8 }
 0x2a2   :  { %v1406_v49 = vshrl.u32 %v1405_v11, 23 }
 0x2a3   :  { %v1209_v52 = vsub.s32 32, %v1208_v4  ;;  %v1211_v62 = vshll.u32 %v2188_v12, %v1208_v4  ;;  %v1214_v51 = vshll.u32 %v2189_v14, %v1208_v4  ;;  %v1217_v32 = vshll.u32 %v2190_v17, %v1208_v4 }
 0x2a4   :  { %v1220_v8 = vshll.u32 %v2191_v19, %v1208_v4  ;;  %v1223_v1 = vshll.u32 %v2192_v21, %v1208_v4  ;;  %vm1226_vm8 = vcmp.lt.s32.totalorder %v1207_v35, 1  ;;  %v3056_v59 = vpop.f32.mrb[8].mxu1  ;;  %vm1227_vm7 = vcmp.lt.s32.totalorder %v1207_v35, 2 }
 0x2a5   :  { %v1212_v27 = vshrl.u32 %v2189_v14, %v1209_v52  ;;  %v1215_v58 = vshrl.u32 %v2190_v17, %v1209_v52  ;;  %v1218_v57 = vshrl.u32 %v2191_v19, %v1209_v52  ;;  %v1996_v13 = vpop.f32.mrb[9].mxu1  ;;  %v1210_v37 = vshrl.u32 %v2188_v12, %v1209_v52 }
 0x2a6   :  { %v1221_v55 = vshrl.u32 %v2192_v21, %v1209_v52  ;;  %v1224_v29 = vshrl.u32 %v2193_v28, %v1209_v52  ;;  %vm1228_vm12 = vcmp.lt.s32.totalorder %v1207_v35, 3  ;;  %vm1309_vm15 = vcmp.gt.s32.totalorder %v1308_v43, 0 }
 0x2a7   :  { %v1213_v25 = vor.u32 %v1212_v27, %v1211_v62  ;;  %v1216_v7 = vor.u32 %v1215_v58, %v1214_v51  ;;  %v1219_v6 = vor.u32 %v1218_v57, %v1217_v32  ;;  %vm1229_vm2 = vcmp.lt.s32.totalorder %v1207_v35, 4 }
 0x2a8   :  { %v1222_v18 = vor.u32 %v1221_v55, %v1220_v8  ;;  %v1225_v45 = vor.u32 %v1224_v29, %v1223_v1  ;;  %v1310_v16 = vsel %vm1309_vm15, %v1308_v43, 0  ;;  %v3087_v4 = vand.u32 8388607, %v1402_v24 }
 0x2a9   :  { %v1230_v38 = vsel %vm1226_vm8, %v1210_v37, %v1213_v25  ;;  %v1231_v9 = vsel %vm1229_vm2, %v1219_v6, 2102212464  ;;  %v1234_v60 = vsel %vm1226_vm8, %v1213_v25, %v1216_v7  ;;  %v1238_v15 = vsel %vm1226_vm8, %v1216_v7, %v1219_v6 }
 0x2aa   :  { %v1232_v2 = vsel %vm1228_vm12, %v1216_v7, %v1231_v9  ;;  %v1235_v5 = vsel %vm1229_vm2, %v1222_v18, 920167782  ;;  %v1239_v46 = vsel %vm1229_vm2, %v1225_v45, 1326507024  ;;  %v1311_v54 = vshrl.u32 %v1310_v16, 5 }
 0x2ab   :  { %v1233_v42 = vsel %vm1227_vm7, %v1230_v38, %v1232_v2  ;;  %v1236_v3 = vsel %vm1228_vm12, %v1219_v6, %v1235_v5  ;;  %v1240_v41 = vsel %vm1228_vm12, %v1222_v18, %v1239_v46  ;;  %v1312_v56 = vand.u32 31, %v1310_v16 }
 0x2ac   :  { %v1237_v20 = vsel %vm1227_vm7, %v1234_v60, %v1236_v3  ;;  %v1241_v63 = vsel %vm1227_vm7, %v1238_v15, %v1240_v41  ;;  %v1249_v33 = vmul.u32 %v3047_v36, %v1233_v42  ;;  %vm1330_vm5 = vcmp.lt.s32.totalorder %v1311_v54, 1 }
 0x2ad   :  { %v3076_v23 = vmul.u32.u64.low %v3047_v36, %v1241_v63  ;;  %v3077_v39 = vmul.u32.u64.high %v3047_v36, %v1241_v63, %v3076_v23  ;;  %v3080_v47 = vmul.u32.u64.low %v3047_v36, %v1237_v20  ;;  %v3081_v22 = vmul.u32.u64.high %v3047_v36, %v1237_v20, %v3080_v47 }
 0x2ae   :  { %v1313_v44 = vsub.s32 32, %v1312_v56  ;;  %v1315_v35 = vshll.u32 %v2188_v12, %v1312_v56  ;;  %v1318_v0 = vshll.u32 %v2189_v14, %v1312_v56  ;;  %v1321_v26 = vshll.u32 %v2190_v17, %v1312_v56 }
 0x2af   :  { %v1324_v36 = vshll.u32 %v2191_v19, %v1312_v56  ;;  %vm1251_vm9 = vc.u32 %v3077_v39, %v3080_v47  ;;  %v1252_v11 = vadd.s32 1, %v3081_v22  ;;  %v1327_v32 = vshll.u32 %v2192_v21, %v1312_v56 }
 0x2b0   :  { %v1316_v52 = vshrl.u32 %v2189_v14, %v1313_v44  ;;  %v1319_v62 = vshrl.u32 %v2190_v17, %v1313_v44  ;;  %v1322_v51 = vshrl.u32 %v2191_v19, %v1313_v44  ;;  %v1325_v43 = vshrl.u32 %v2192_v21, %v1313_v44 }
 0x2b1   :  { %v1328_v58 = vshrl.u32 %v2193_v28, %v1313_v44  ;;  %v1253_v57 = vsel %vm1251_vm9, %v1252_v11, %v3081_v22  ;;  %vm1332_vm11 = vcmp.lt.s32.totalorder %v1311_v54, 3  ;;  %vm1333_vm1 = vcmp.lt.s32.totalorder %v1311_v54, 4 }
 0x2b2   :  { %v1317_v8 = vor.u32 %v1316_v52, %v1315_v35  ;;  %v1320_v1 = vor.u32 %v1319_v62, %v1318_v0  ;;  %v1323_v27 = vor.u32 %v1322_v51, %v1321_v26  ;;  %v1326_v13 = vor.u32 %v1325_v43, %v1324_v36 }
 0x2b3   :  { %v1254_v37 = vadd.s32 %v1253_v57, %v1249_v33  ;;  %v1314_v55 = vshrl.u32 %v2188_v12, %v1313_v44  ;;  %v1329_v29 = vor.u32 %v1328_v58, %v1327_v32  ;;  %v1898_v45 = vadd.s32 4294967169, %v1406_v49  ;;  %v1077_v33 = vpop.permute.xlu1 %1076 }
 0x2b4   :  { %v1335_v25 = vsel %vm1333_vm1, %v1323_v27, 2102212464  ;;  %v1338_v7 = vsel %vm1330_vm5, %v1317_v8, %v1320_v1  ;;  %v1339_v6 = vsel %vm1333_vm1, %v1326_v13, 920167782  ;;  %v1342_v18 = vsel %vm1330_vm5, %v1320_v1, %v1323_v27 }
 0x2b5   :  { %v1255_v16 = vadd.s32 536870912, %v1254_v37  ;;  %vm1331_vm6 = vcmp.lt.s32.totalorder %v1311_v54, 2  ;;  %v1340_v38 = vsel %vm1332_vm11, %v1323_v27, %v1339_v6  ;;  %v1343_v9 = vsel %vm1333_vm1, %v1329_v29, 1326507024 }
 0x2b6   :  { %v1334_v60 = vsel %vm1330_vm5, %v1314_v55, %v1317_v8  ;;  %v1336_v15 = vsel %vm1332_vm11, %v1320_v1, %v1335_v25  ;;  %v1341_v2 = vsel %vm1331_vm6, %v1338_v7, %v1340_v38  ;;  %v1344_v5 = vsel %vm1332_vm11, %v1326_v13, %v1343_v9 }
 0x2b7   :  { %v3110_v46 = vshrl.u32 %v1255_v16, 30  ;;  %v1345_v42 = vsel %vm1331_vm6, %v1342_v18, %v1344_v5  ;;  %v3113_v3 = vmul.u32.u64.low %v3073_v34, %v1341_v2  ;;  %v3114_v41 = vmul.u32.u64.high %v3073_v34, %v1341_v2, %v3113_v3 }
 0x2b8   :  { %v3118_v56 = vmul.u32.u64.low %v3073_v34, %v1345_v42  ;;  %v3119_v20 = vmul.u32.u64.high %v3073_v34, %v1345_v42, %v3118_v56  ;;  %v1412_v63 = vadd.s32 1, %v1898_v45  ;;  %v1337_v22 = vsel %vm1331_vm6, %v1334_v60, %v1336_v15 }
 0x2b9   :  { %v1257_v23 = vshll.u32 %v3110_v46, 30  ;;  %v1410_v54 = vor.u32 8388608, %v3087_v4  ;;  %v1356_v49 = vadd.s32 1, %v3114_v41  ;;  %v3125_v0 = vadd.f32 %v3045_v53, %v1077_v33 }
 0x2ba   :  { %vm1413_vm10 = vcmp.gt.s32.totalorder %v1412_v63, 0  ;;  %v1353_v26 = vmul.u32 %v3073_v34, %v1337_v22  ;;  %vm1355_vm14 = vc.u32 %v3119_v20, %v3113_v3  ;;  %v1250_v4 = vadd.s32 %v3080_v47, %v3077_v39 }
 0x2bb   :  { %v1258_v44 = vsub.s32 %v1254_v37, %v1257_v23  ;;  %v1414_v35 = vsel %vm1413_vm10, %v1412_v63, 0  ;;  %v1357_v62 = vsel %vm1355_vm14, %v1356_v49, %v3114_v41  ;;  %v1280_v36 = vsub.s32 4, %v3110_v46 }
 0x2bc   :  { %v1416_v51 = vand.u32 31, %v1414_v35  ;;  %v1358_v11 = vadd.s32 %v1357_v62, %v1353_v26  ;;  %v3134_v43 = vshll.u32 %v1410_v54, 8  ;;  %v1415_v53 = vshrl.u32 %v1414_v35, 5 }
 0x2bd   :  { %v1260_v52 = vsub.s32 0, %v1258_v44  ;;  %v1509_v34 = vand.u32 2139095040, %v3125_v0  ;;  %vm3179_vm12 = vcmp.le.f32.partialorder %v1194_v10, 0.7853982  ;;  %vm1196_vm15 = vcmp.lt.s32.totalorder %v3031_v30, 0 }
 0x2be   :  { %v1417_v8 = vsub.s32 32, %v1416_v51  ;;  %v1359_v1 = vadd.s32 536870912, %v1358_v11  ;;  %v1419_v27 = vshll.u32 %v2188_v12, %v1416_v51  ;;  %v1422_v58 = vshll.u32 %v2189_v14, %v1416_v51 }
 0x2bf   :  { %v1891_v32 = vmin.u32 %v1260_v52, %v1258_v44  ;;  %v1425_v57 = vshll.u32 %v2190_v17, %v1416_v51  ;;  %v1428_v37 = vshll.u32 %v2191_v19, %v1416_v51  ;;  %vm1434_vm0 = vcmp.lt.s32.totalorder %v1415_v53, 1 }
 0x2c0   :  { %v1420_v39 = vshrl.u32 %v2189_v14, %v1417_v8  ;;  %v1423_v47 = vshrl.u32 %v2190_v17, %v1417_v8  ;;  %v3143_v55 = vshrl.u32 %v1359_v1, 30  ;;  %v1426_v29 = vshrl.u32 %v2191_v19, %v1417_v8 }
 0x2c1   :  { %v1262_v13 = vclz %v1891_v32  ;;  %v1429_v25 = vshrl.u32 %v2192_v21, %v1417_v8  ;;  %v1432_v7 = vshrl.u32 %v2193_v28, %v1417_v8  ;;  %v1431_v60 = vshll.u32 %v2192_v21, %v1416_v51 }
 0x2c2   :  { %v1421_v18 = vor.u32 %v1420_v39, %v1419_v27  ;;  %v1424_v45 = vor.u32 %v1423_v47, %v1422_v58  ;;  %v1361_v16 = vshll.u32 %v3143_v55, 30  ;;  %v1427_v38 = vor.u32 %v1426_v29, %v1425_v57 }
 0x2c3   :  { %v1892_v6 = vadd.s32 4294967294, %v1262_v13  ;;  %v1430_v9 = vor.u32 %v1429_v25, %v1428_v37  ;;  %v1418_v15 = vshrl.u32 %v2188_v12, %v1417_v8  ;;  %vm1435_vm13 = vcmp.lt.s32.totalorder %v1415_v53, 2 }
 0x2c4   :  { %vm1437_vm8 = vcmp.lt.s32.totalorder %v1415_v53, 4  ;;  %v3151_v5 = vsub.s32 %v1358_v11, %v1361_v16  ;;  %v1433_v42 = vor.u32 %v1432_v7, %v1431_v60  ;;  %vm1436_vm7 = vcmp.lt.s32.totalorder %v1415_v53, 3  ;;  %v1082_v7 = vpop.permute.xlu0 %1081 }
 0x2c5   :  { %vm1893_vm4 = vcmp.lt.s32.totalorder %v1892_v6, 0  ;;  %v1439_v41 = vsel %vm1437_vm8, %v1427_v38, 2102212464  ;;  %v1442_v23 = vsel %vm1434_vm0, %v1421_v18, %v1424_v45  ;;  %v1438_v54 = vsel %vm1434_vm0, %v1418_v15, %v1421_v18 }
 0x2c6   :  { %v1265_v2 = vsel %vm1893_vm4, 0, %v1892_v6  ;;  %v1364_v33 = vsub.s32 0, %v3151_v5  ;;  %v1443_v49 = vsel %vm1437_vm8, %v1430_v9, 920167782  ;;  %v1440_v52 = vsel %vm1436_vm7, %v1424_v45, %v1439_v41 }
 0x2c7   :  { %v1266_v56 = vsub.s32 32, %v1265_v2  ;;  %v1270_v63 = vsub.s32 4294967266, %v1265_v2  ;;  %v1267_v22 = vshll.u32 %v1258_v44, %v1265_v2  ;;  %v1444_v62 = vsel %vm1436_vm7, %v1427_v38, %v1443_v49 }
 0x2c8   :  { %v1895_v51 = vmin.u32 %v1364_v33, %v3151_v5  ;;  %v1445_v11 = vsel %vm1435_vm13, %v1442_v23, %v1444_v62  ;;  %v1446_v32 = vsel %vm1434_vm0, %v1424_v45, %v1427_v38  ;;  %v1447_v44 = vsel %vm1437_vm8, %v1433_v42, 1326507024 }
 0x2c9   :  { %v1268_v35 = vshrl.u32 %v1250_v4, %v1266_v56  ;;  %v1271_v26 = vadd.s32 127, %v1270_v63  ;;  %v1448_v27 = vsel %vm1436_vm7, %v1430_v9, %v1447_v44  ;;  %v1506_v58 = vand.u32 2147483647, %v3125_v0 }
 0x2ca   :  { %v1366_v4 = vclz %v1895_v51  ;;  %v1449_v57 = vsel %vm1435_vm13, %v1446_v32, %v1448_v27  ;;  %v3168_v13 = vmul.u32.u64.low %v3134_v43, %v1445_v11  ;;  %v3169_v39 = vmul.u32.u64.high %v3134_v43, %v1445_v11, %v3168_v13 }
 0x2cb   :  { %v1269_v8 = vor.u32 %v1268_v35, %v1267_v22  ;;  %v1272_v1 = vshll.u32 %v1271_v26, 23  ;;  %v1441_v37 = vsel %vm1435_vm13, %v1438_v54, %v1440_v52  ;;  %v1510_v45 = vshrl.u32 %v1509_v34, 23 }
 0x2cc   :  { %v3174_v29 = vmul.u32.u64.low %v3134_v43, %v1449_v57  ;;  %v3175_v25 = vmul.u32.u64.high %v3134_v43, %v1449_v57, %v3174_v29  ;;  %v1896_v18 = vadd.s32 4294967294, %v1366_v4  ;;  %v1281_v53 = vsel %vm1196_vm15, %v1280_v36, %v3110_v46 }
 0x2cd   :  { %v1273_v47 = vor.u32 4788187, %v1272_v1  ;;  %v1276_v38 = vcvt.s32.f32 %v1269_v8  ;;  %v3190_v9 = vadd.f32 %v3056_v59, %v1082_v7  ;;  %v1457_v10 = vmul.u32 %v3134_v43, %v1441_v37 }
 0x2ce   :  { %vm1897_vm2 = vcmp.lt.s32.totalorder %v1896_v18, 0  ;;  %v1460_v60 = vadd.s32 1, %v3169_v39  ;;  %v1902_v15 = vadd.s32 4294967169, %v1510_v45  ;;  %vm1459_vm5 = vc.u32 %v3175_v25, %v3168_v13 }
 0x2cf   :  { %v1274_v16 = vand.u32 2147483647, %v1273_v47  ;;  %v1369_v42 = vsel %vm1897_vm2, 0, %v1896_v18  ;;  %v1513_v34 = vand.u32 8388607, %v1506_v58  ;;  %v1354_v46 = vadd.s32 %v3113_v3, %v3119_v20 }
 0x2d0   :  { %v1370_v36 = vsub.s32 32, %v1369_v42  ;;  %v1374_v59 = vsub.s32 4294967266, %v1369_v42  ;;  %v1461_v41 = vsel %vm1459_vm5, %v1460_v60, %v3169_v39  ;;  %v1283_v43 = vsel %vm3179_vm12, 0, %v1281_v53 }
 0x2d1   :  { %v1277_v2 = vmul.f32 %v1276_v38, %v1274_v16  ;;  %v1462_v63 = vadd.s32 %v1461_v41, %v1457_v10  ;;  %v1516_v23 = vadd.s32 1, %v1902_v15  ;;  %v1371_v22 = vshll.u32 %v3151_v5, %v1369_v42 }
 0x2d2   :  { %v1372_v33 = vshrl.u32 %v1354_v46, %v1370_v36  ;;  %v1375_v54 = vadd.s32 127, %v1374_v59  ;;  %v1613_v49 = vand.u32 2139095040, %v3190_v9  ;;  %v1514_v20 = vor.u32 8388608, %v1513_v34 }
 0x2d3   :  { %v1278_v56 = vxor.u32 2147483648, %v1277_v2  ;;  %v1463_v3 = vadd.s32 536870912, %v1462_v63  ;;  %vm1517_vm9 = vcmp.gt.s32.totalorder %v1516_v23, 0  ;;  %v3212_v32 = vadd.s32 3, %v1283_v43 }
 0x2d4   :  { %v1373_v52 = vor.u32 %v1372_v33, %v1371_v22  ;;  %v1376_v62 = vshll.u32 %v1375_v54, 23  ;;  %v1518_v51 = vsel %vm1517_vm9, %v1516_v23, 0  ;;  %vm1300_vm11 = vcmp.lt.s32.totalorder %v3035_v31, 0 }
 0x2d5   :  { %v1279_v35 = vsel %vm1196_vm15, %v1278_v56, %v1277_v2  ;;  %v3210_v11 = vshrl.u32 %v1463_v3, 30  ;;  %v1520_v5 = vand.u32 31, %v1518_v51  ;;  %v1384_v8 = vsub.s32 4, %v3143_v55 }
 0x2d6   :  { %v1282_v26 = vsel %vm3179_vm12, %v3031_v30, %v1279_v35  ;;  %v1377_v44 = vor.u32 4788187, %v1376_v62  ;;  %v3217_v4 = vshll.u32 %v1514_v20, 8  ;;  %v1380_v39 = vcvt.s32.f32 %v1373_v52 }
 0x2d7   :  { %v1465_v1 = vshll.u32 %v3210_v11, 30  ;;  %v1521_v27 = vsub.s32 32, %v1520_v5  ;;  %v1519_v47 = vshrl.u32 %v1518_v51, 5  ;;  %v1614_v37 = vshrl.u32 %v1613_v49, 23 }
 0x2d8   :  { %v1378_v57 = vand.u32 2147483647, %v1377_v44  ;;  %v1523_v7 = vshll.u32 %v2188_v12, %v1520_v5  ;;  %v1526_v18 = vshll.u32 %v2189_v14, %v1520_v5  ;;  %v1529_v38 = vshll.u32 %v2190_v17, %v1520_v5 }
 0x2d9   :  { %v3219_v29 = vsub.s32 %v1462_v63, %v1465_v1  ;;  %v1524_v6 = vshrl.u32 %v2189_v14, %v1521_v27  ;;  %v1527_v16 = vshrl.u32 %v2190_v17, %v1521_v27  ;;  %v1530_v53 = vshrl.u32 %v2191_v19, %v1521_v27 }
 0x2da   :  { %v1381_v45 = vmul.f32 %v1380_v39, %v1378_v57  ;;  %2143 = vsinq.f32 %v1282_v26  ;;  %v1532_v60 = vshll.u32 %v2191_v19, %v1520_v5  ;;  %v1533_v15 = vshrl.u32 %v2192_v21, %v1521_v27 }
 0x2db   :  { %v1468_v10 = vsub.s32 0, %v3219_v29  ;;  %v1525_v42 = vor.u32 %v1524_v6, %v1523_v7  ;;  %v1528_v34 = vor.u32 %v1527_v16, %v1526_v18  ;;  %v1531_v46 = vor.u32 %v1530_v53, %v1529_v38 }
 0x2dc   :  { %v1382_v2 = vxor.u32 2147483648, %v1381_v45  ;;  %v1534_v59 = vor.u32 %v1533_v15, %v1532_v60  ;;  %v1535_v41 = vshll.u32 %v2192_v21, %v1520_v5  ;;  %v1536_v56 = vshrl.u32 %v2193_v28, %v1521_v27 }
 0x2dd   :  { %v1899_v36 = vmin.u32 %v1468_v10, %v3219_v29  ;;  %2145 = vcosq.f32 %v1282_v26  ;;  %v1522_v43 = vshrl.u32 %v2188_v12, %v1521_v27  ;;  %vm1538_vm1 = vcmp.lt.s32.totalorder %v1519_v47, 1 }
 0x2de   :  { %v1906_v63 = vadd.s32 4294967169, %v1614_v37  ;;  %v1383_v23 = vsel %vm1300_vm11, %v1382_v2, %v1381_v45  ;;  %v1537_v33 = vor.u32 %v1536_v56, %v1535_v41  ;;  %vm1541_vm6 = vcmp.lt.s32.totalorder %v1519_v47, 4 }
 0x2df   :  { %v1470_v22 = vclz %v1899_v36  ;;  %vm1540_vm10 = vcmp.lt.s32.totalorder %v1519_v47, 3  ;;  %v1543_v54 = vsel %vm1541_vm6, %v1531_v46, 2102212464  ;;  %v1546_v49 = vsel %vm1538_vm1, %v1525_v42, %v1528_v34 }
 0x2e0   :  { %v1547_v35 = vsel %vm1541_vm6, %v1534_v59, 920167782  ;;  %vm1539_vm14 = vcmp.lt.s32.totalorder %v1519_v47, 2  ;;  %v1542_v20 = vsel %vm1538_vm1, %v1522_v43, %v1525_v42  ;;  %v1544_v52 = vsel %vm1540_vm10, %v1528_v34, %v1543_v54 }
 0x2e1   :  { %v1900_v3 = vadd.s32 4294967294, %v1470_v22  ;;  %v1548_v26 = vsel %vm1540_vm10, %v1531_v46, %v1547_v35  ;;  %v1550_v51 = vsel %vm1538_vm1, %v1528_v34, %v1531_v46  ;;  %v1551_v5 = vsel %vm1541_vm6, %v1537_v33, 1326507024 }
 0x2e2   :  { %v1549_v62 = vsel %vm1539_vm14, %v1546_v49, %v1548_v26  ;;  %v1552_v44 = vsel %vm1540_vm10, %v1534_v59, %v1551_v5  ;;  %vm3247_vm4 = vcmp.le.f32.partialorder %v1298_v61, 0.7853982  ;;  %v1610_v7 = vand.u32 2147483647, %v3190_v9 }
 0x2e3   :  { %vm1901_vm0 = vcmp.lt.s32.totalorder %v1900_v3, 0  ;;  %v3241_v1 = vmul.u32.u64.low %v3217_v4, %v1549_v62  ;;  %v3242_v27 = vmul.u32.u64.high %v3217_v4, %v1549_v62, %v3241_v1  ;;  %v1553_v37 = vsel %vm1539_vm14, %v1550_v51, %v1552_v44 }
 0x2e4   :  { %v1473_v39 = vsel %vm1901_vm0, 0, %v1900_v3  ;;  %v3253_v6 = vpop.eup %2143  ;;  %v1385_v18 = vsel %vm1300_vm11, %v1384_v8, %v3143_v55  ;;  %v1386_v45 = vsel %vm3247_vm4, %v3035_v31, %v1383_v23  ;;  %v1620_v61 = vadd.s32 1, %v1906_v63 }
 0x2e5   :  { %v1478_v16 = vsub.s32 4294967266, %v1473_v39  ;;  %v1545_v38 = vsel %vm1539_vm14, %v1542_v20, %v1544_v52  ;;  %v3263_v53 = vmul.u32.u64.low %v3217_v4, %v1553_v37  ;;  %v3264_v10 = vmul.u32.u64.high %v3217_v4, %v1553_v37, %v3263_v53 }
 0x2e6   :  { %v3267_v60 = vand.u32 3, %v3212_v32  ;;  %v1474_v15 = vsub.s32 32, %v1473_v39  ;;  %v1564_v42 = vadd.s32 1, %v3242_v27  ;;  %vm1621_vm13 = vcmp.gt.s32.totalorder %v1620_v61, 0 }
 0x2e7   :  { %v1479_v2 = vadd.s32 127, %v1478_v16  ;;  %v3270_v55 = vpop.eup %2145  ;;  %v1387_v8 = vsel %vm3247_vm4, 0, %v1385_v18  ;;  %v1617_v47 = vand.u32 8388607, %v1610_v7  ;;  %v1622_v34 = vsel %vm1621_vm13, %v1620_v61, 0 }
 0x2e8   :  { %v1291_v46 = vxor.u32 2147483648, %v3253_v6  ;;  %v1458_v32 = vadd.s32 %v3168_v13, %v3175_v25  ;;  %v1624_v59 = vand.u32 31, %v1622_v34  ;;  %vm1290_vm8 = vcmp.eq.s32.totalorder %v3267_v60, 0 }
 0x2e9   :  { %v1480_v36 = vshll.u32 %v1479_v2, 23  ;;  %2147 = vcosq.f32 %v1386_v45  ;;  %v1561_v41 = vmul.u32 %v3217_v4, %v1545_v38  ;;  %vm1563_vm7 = vc.u32 %v3264_v10, %v3241_v1 }
 0x2ea   :  { %v3284_v56 = vsel %vm1290_vm8, %v3270_v55, %v1291_v46  ;;  %2149 = vsinq.f32 %v1386_v45  ;;  %v1476_v43 = vshrl.u32 %v1458_v32, %v1474_v15  ;;  %v1565_v63 = vsel %vm1563_vm7, %v1564_v42, %v3242_v27 }
 0x2eb   :  { %v1625_v23 = vsub.s32 32, %v1624_v59  ;;  %v1475_v13 = vshll.u32 %v3219_v29, %v1473_v39  ;;  %v1481_v25 = vor.u32 4788187, %v1480_v36  ;;  %v1566_v22 = vadd.s32 %v1565_v63, %v1561_v41 }
 0x2ec   :  { %v1618_v33 = vor.u32 8388608, %v1617_v47  ;;  %v1627_v54 = vshll.u32 %v2188_v12, %v1624_v59  ;;  %v1630_v49 = vshll.u32 %v2189_v14, %v1624_v59  ;;  %v1633_v20 = vshll.u32 %v2190_v17, %v1624_v59 }
 0x2ed   :  { %v1628_v4 = vshrl.u32 %v2189_v14, %v1625_v23  ;;  %v1631_v35 = vshrl.u32 %v2190_v17, %v1625_v23  ;;  %v1567_v3 = vadd.s32 536870912, %v1566_v22  ;;  %v1634_v26 = vshrl.u32 %v2191_v19, %v1625_v23 }
 0x2ee   :  { %v1637_v52 = vshrl.u32 %v2192_v21, %v1625_v23  ;;  %v1477_v62 = vor.u32 %v1476_v43, %v1475_v13  ;;  %v1623_v29 = vshrl.u32 %v1622_v34, 5  ;;  %v1636_v5 = vshll.u32 %v2191_v19, %v1624_v59 }
 0x2ef   :  { %v1629_v51 = vor.u32 %v1628_v4, %v1627_v54  ;;  %v3296_v44 = vshrl.u32 %v1567_v3, 30  ;;  %v1632_v27 = vor.u32 %v1631_v35, %v1630_v49  ;;  %v1635_v57 = vor.u32 %v1634_v26, %v1633_v20 }
 0x2f0   :  { %v1640_v14 = vshrl.u32 %v2193_v28, %v1625_v23  ;;  %v1482_v39 = vand.u32 2147483647, %v1481_v25  ;;  %v1638_v37 = vor.u32 %v1637_v52, %v1636_v5  ;;  %v1639_v18 = vshll.u32 %v2192_v21, %v1624_v59 }
 0x2f1   :  { %v1391_v17 = vadd.s32 3, %v1387_v8  ;;  %v1569_v45 = vshll.u32 %v3296_v44, 30  ;;  %v1658_v16 = vshll.u32 %v1618_v33, 8  ;;  %v1484_v61 = vcvt.s32.f32 %v1477_v62 }
 0x2f2   :  { %v1641_v38 = vor.u32 %v1640_v14, %v1639_v18  ;;  %vm1642_vm12 = vcmp.lt.s32.totalorder %v1623_v29, 1  ;;  %vm1645_vm15 = vcmp.lt.s32.totalorder %v1623_v29, 4  ;;  %vm1289_vm2 = vcmp.lt.s32.totalorder %v3267_v60, 2 }
 0x2f3   :  { %v2148_v19 = vpop.eup %2147  ;;  %v3302_v53 = vsub.s32 %v1566_v22, %v1569_v45  ;;  %v1626_v15 = vshrl.u32 %v2188_v12, %v1625_v23  ;;  %v1647_v28 = vsel %vm1645_vm15, %v1635_v57, 2102212464  ;;  %v1650_v2 = vsel %vm1642_vm12, %v1629_v51, %v1632_v27 }
 0x2f4   :  { %vm1286_vm5 = vweird.f32 %v3031_v30  ;;  %v2150_v21 = vpop.eup %2149  ;;  %v1485_v42 = vmul.f32 %v1484_v61, %v1482_v39  ;;  %vm1644_vm9 = vcmp.lt.s32.totalorder %v1623_v29, 3  ;;  %v1651_v8 = vsel %vm1645_vm15, %v1638_v37, 920167782 }
 0x2f5   :  { %vm1293_vm11 = vcmp.eq.s32.totalorder %v3267_v60, 2  ;;  %v1572_v47 = vsub.s32 0, %v3302_v53  ;;  %vm1643_vm1 = vcmp.lt.s32.totalorder %v1623_v29, 2  ;;  %v1646_v34 = vsel %vm1642_vm12, %v1626_v15, %v1629_v51 }
 0x2f6   :  { %v1652_v46 = vsel %vm1644_vm9, %v1635_v57, %v1651_v8  ;;  %vm1390_vm6 = vweird.f32 %v3035_v31  ;;  %v1648_v12 = vsel %vm1644_vm9, %v1632_v27, %v1647_v28  ;;  %v1654_v36 = vsel %vm1642_vm12, %v1632_v27, %v1635_v57 }
 0x2f7   :  { %v1653_v32 = vsel %vm1643_vm1, %v1650_v2, %v1652_v46  ;;  %v1655_v59 = vsel %vm1645_vm15, %v1641_v38, 1326507024  ;;  %v1903_v41 = vmin.u32 %v1572_v47, %v3302_v53  ;;  %v1294_v25 = vxor.u32 2147483648, %v3270_v55 }
 0x2f8   :  { %v1656_v43 = vsel %vm1644_vm9, %v1638_v37, %v1655_v59  ;;  %v3317_v63 = vmul.u32.u64.low %v1658_v16, %v1653_v32  ;;  %v3318_v23 = vmul.u32.u64.high %v1658_v16, %v1653_v32, %v3317_v63  ;;  %v1392_v22 = vand.u32 3, %v1391_v17 }
 0x2f9   :  { %v1657_v13 = vsel %vm1643_vm1, %v1654_v36, %v1656_v43  ;;  %v1395_v33 = vxor.u32 2147483648, %v2150_v21  ;;  %v1574_v54 = vclz %v1903_v41  ;;  %v1398_v35 = vxor.u32 2147483648, %v2148_v19 }
 0x2fa   :  { %v3323_v4 = vmul.u32.u64.low %v1658_v16, %v1657_v13  ;;  %v3324_v49 = vmul.u32.u64.high %v1658_v16, %v1657_v13, %v3323_v4  ;;  %v1649_v3 = vsel %vm1643_vm1, %v1646_v34, %v1648_v12  ;;  %v1295_v20 = vsel %vm1293_vm11, %v1294_v25, %v3253_v6 }
 0x2fb   :  { %vm1394_vm10 = vcmp.eq.s32.totalorder %v1392_v22, 0  ;;  %vm1397_vm14 = vcmp.eq.s32.totalorder %v1392_v22, 2  ;;  %v1904_v26 = vadd.s32 4294967294, %v1574_v54  ;;  %v1668_v52 = vadd.s32 1, %v3318_v23 }
 0x2fc   :  { %v1296_v55 = vsel %vm1289_vm2, %v3284_v56, %v1295_v20  ;;  %v1396_v62 = vsel %vm1394_vm10, %v2148_v19, %v1395_v33  ;;  %v1486_v51 = vxor.u32 2147483648, %v1485_v42  ;;  %vm1393_vm0 = vcmp.lt.s32.totalorder %v1392_v22, 2 }
 0x2fd   :  { %v1297_v5 = vsel %vm1286_vm5, nan, %v1296_v55  ;;  %v1399_v29 = vsel %vm1397_vm14, %v1398_v35, %v2150_v21  ;;  %vm1905_vm4 = vcmp.lt.s32.totalorder %v1904_v26, 0  ;;  %v1665_v27 = vmul.u32 %v1658_v16, %v1649_v3 }
 0x2fe   :  { %vm1667_vm13 = vc.u32 %v3324_v49, %v3317_v63  ;;  %v1400_v6 = vsel %vm1393_vm0, %v1396_v62, %v1399_v29  ;;  %vm1404_vm8 = vcmp.lt.s32.totalorder %v3043_v40, 0  ;;  %v1577_v57 = vsel %vm1905_vm4, 0, %v1904_v26 }
 0x2ff   :  { %v1669_v14 = vsel %vm1667_vm13, %v1668_v52, %v3318_v23  ;;  %v1401_v60 = vsel %vm1390_vm6, nan, %v1400_v6  ;;  %v1562_v30 = vadd.s32 %v3241_v1, %v3264_v10  ;;  %v1578_v56 = vsub.s32 32, %v1577_v57 }
 0x300   :  { %v1582_v39 = vsub.s32 4294967266, %v1577_v57  ;;  %v1670_v37 = vadd.s32 %v1669_v14, %v1665_v27  ;;  %v1487_v18 = vsel %vm1404_vm8, %v1486_v51, %v1485_v42  ;;  %v2038_v17 = vpack.c.bf16 %v1401_v60, %v1297_v5 }
 0x301   :  { %v1579_v45 = vshll.u32 %v3302_v53, %v1577_v57  ;;  %v1580_v16 = vshrl.u32 %v1562_v30, %v1578_v56  ;;  %vm3349_vm7 = vcmp.le.f32.partialorder %v1402_v24, 0.7853982  ;;  %v1488_v2 = vsub.s32 4, %v3210_v11 }
 0x302   :  { %v1583_v61 = vadd.s32 127, %v1582_v39  ;;  %v1671_v38 = vadd.s32 536870912, %v1670_v37  ;;  %2039 = vmatpush3.bf16.msra.mxu0 %v2038_v17  ;;  %v1490_v53 = vsel %vm3349_vm7, %v3043_v40, %v1487_v18  ;;  %v1592_v47 = vsub.s32 4, %v3296_v44 }
 0x303   :  { %v1581_v1 = vor.u32 %v1580_v16, %v1579_v45  ;;  %2040 = vmatprep.subr.bf16.mxu0 %v3442_v50  ;;  %2151 = vsinq.f32 %v1490_v53  ;;  %v1489_v50 = vsel %vm1404_vm8, %v1488_v2, %v3210_v11  ;;  %vm3367_vm12 = vcmp.le.f32.partialorder %v1506_v58, 0.7853982 }
 0x304   :  { %v1584_v10 = vshll.u32 %v1583_v61, 23  ;;  %v3353_v19 = vshrl.u32 %v1671_v38, 30  ;;  %2153 = vcosq.f32 %v1490_v53  ;;  %vm1508_vm15 = vcmp.lt.s32.totalorder %v3125_v0, 0 }
 0x305   :  { %v1588_v21 = vcvt.s32.f32 %v1581_v1  ;;  %v1491_v36 = vsel %vm3349_vm7, 0, %v1489_v50  ;;  %v1593_v41 = vsel %vm1508_vm15, %v1592_v47, %v3296_v44  ;;  %v1666_v44 = vadd.s32 %v3317_v63, %v3324_v49  ;;  %v1714_v47 = vld [vmem:[%s3422_s5] sm:$0xff]  ;;  %v1715_v50 = vld [vmem:[%s3422_s5 + $0x8] sm:$0xff] }
 0x306   :  { %v1585_v15 = vor.u32 4788187, %v1584_v10  ;;  %v1673_v28 = vshll.u32 %v3353_v19, 30  ;;  %v1495_v13 = vadd.s32 3, %v1491_v36  ;;  %v1595_v58 = vsel %vm3367_vm12, 0, %v1593_v41 }
 0x307   :  { %v1599_v54 = vadd.s32 3, %v1595_v58  ;;  %v1696_v45 = vsub.s32 4, %v3353_v19  ;;  %vm1494_vm14 = vweird.f32 %v3043_v40  ;;  %vm1598_vm0 = vweird.f32 %v3125_v0 }
 0x308   :  { %v1586_v24 = vand.u32 2147483647, %v1585_v15  ;;  %v1674_v42 = vsub.s32 %v1670_v37, %v1673_v28  ;;  %v1496_v3 = vand.u32 3, %v1495_v13  ;;  %vm1612_vm4 = vcmp.lt.s32.totalorder %v3190_v9, 0 }
 0x309   :  { %v1600_v29 = vand.u32 3, %v1599_v54  ;;  %vm1611_vm13 = vcmp.le.f32.partialorder %v1610_v7, 0.7853982  ;;  %v1697_v53 = vsel %vm1612_vm4, %v1696_v45, %v3353_v19 }
 0x30a   :  { %v1589_v8 = vmul.f32 %v1588_v21, %v1586_v24  ;;  %v1676_v34 = vsub.s32 0, %v1674_v42  ;;  %vm1498_vm5 = vcmp.eq.s32.totalorder %v1496_v3, 0  ;;  %vm1501_vm9 = vcmp.eq.s32.totalorder %v1496_v3, 2 }
 0x30b   :  { %vm1497_vm11 = vcmp.lt.s32.totalorder %v1496_v3, 2  ;;  %vm1605_vm1 = vcmp.eq.s32.totalorder %v1600_v29, 2  ;;  %vm1602_vm6 = vcmp.eq.s32.totalorder %v1600_v29, 0  ;;  %vm1601_vm10 = vcmp.lt.s32.totalorder %v1600_v29, 2 }
 0x30c   :  { %v1590_v46 = vxor.u32 2147483648, %v1589_v8  ;;  %v1907_v12 = vmin.u32 %v1676_v34, %v1674_v42  ;;  %v1699_v40 = vsel %vm1611_vm13, 0, %v1697_v53 }
 0x30d   :  { %v2152_v25 = vpop.eup %2151 }
 0x30e   :  { %v1591_v59 = vsel %vm1508_vm15, %v1590_v46, %v1589_v8  ;;  %v1678_v43 = vclz %v1907_v12  ;;  %v2154_v22 = vpop.eup %2153  ;;  %v1499_v20 = vxor.u32 2147483648, %v2152_v25  ;;  %vm1702_vm15 = vweird.f32 %v3190_v9  ;;  %v1723_v46 = vpop.permute.xlu1 %1722 }
 0x30f   :  { %v1594_v11 = vsel %vm3367_vm12, %v3125_v0, %v1591_v59  ;;  %v1502_v62 = vxor.u32 2147483648, %v2154_v22  ;;  %v1703_v0 = vadd.s32 3, %v1699_v40  ;;  %v1728_v59 = vpop.permute.xlu0 %1727 }
 0x310   :  { %2155 = vcosq.f32 %v1594_v11  ;;  %v1908_v23 = vadd.s32 4294967294, %v1678_v43  ;;  %v1500_v57 = vsel %vm1498_vm5, %v2154_v22, %v1499_v20 }
 0x311   :  { %2157 = vsinq.f32 %v1594_v11  ;;  %v1503_v14 = vsel %vm1501_vm9, %v1502_v62, %v2152_v25  ;;  %v1704_v28 = vand.u32 3, %v1703_v0 }
 0x312   :  { %vm1909_vm2 = vcmp.lt.s32.totalorder %v1908_v23, 0  ;;  %v1504_v39 = vsel %vm1497_vm11, %v1500_v57, %v1503_v14 }
 0x313   :  { %v1681_v33 = vsel %vm1909_vm2, 0, %v1908_v23  ;;  %v1505_v38 = vsel %vm1494_vm14, nan, %v1504_v39  ;;  %vm1709_vm8 = vcmp.eq.s32.totalorder %v1704_v28, 2  ;;  %vm1706_vm7 = vcmp.eq.s32.totalorder %v1704_v28, 0  ;;  %v1733_v23 = vpop.permute.xlu1 %1732 }
 0x314   :  { %v1682_v4 = vsub.s32 32, %v1681_v33  ;;  %v1686_v35 = vsub.s32 4294967266, %v1681_v33  ;;  %v1683_v26 = vshll.u32 %v1674_v42, %v1681_v33  ;;  %vm1705_vm12 = vcmp.lt.s32.totalorder %v1704_v28, 2 }
 0x315   :  { %vm1735_vm2 = vcmask 326656  }
 0x316   :  { %v1684_v52 = vshrl.u32 %v1666_v44, %v1682_v4  ;;  %v1687_v55 = vadd.s32 127, %v1686_v35 }
 0x318   :  { %v1685_v51 = vor.u32 %v1684_v52, %v1683_v26  ;;  %v1688_v5 = vshll.u32 %v1687_v55, 23 }
 0x31a   :  { %v2156_v27 = vpop.eup %2155  ;;  %v1689_v6 = vor.u32 4788187, %v1688_v5  ;;  %v1692_v30 = vcvt.s32.f32 %v1685_v51 }
 0x31b   :  { %v2158_v60 = vpop.eup %2157  ;;  %v1606_v63 = vxor.u32 2147483648, %v2156_v27 }
 0x31c   :  { %v1690_v49 = vand.u32 2147483647, %v1689_v6  ;;  %v1603_v56 = vxor.u32 2147483648, %v2158_v60 }
 0x31d   :  { %v1607_v37 = vsel %vm1605_vm1, %v1606_v63, %v2158_v60 }
 0x31e   :  { %v1693_v18 = vmul.f32 %v1692_v30, %v1690_v49  ;;  %v1604_v17 = vsel %vm1602_vm6, %v2156_v27, %v1603_v56 }
 0x31f   :  { %v1608_v16 = vsel %vm1601_vm10, %v1604_v17, %v1607_v37 }
 0x320   :  { %v1694_v61 = vxor.u32 2147483648, %v1693_v18  ;;  %v1609_v31 = vsel %vm1598_vm0, nan, %v1608_v16 }
 0x321   :  { %v2041_v1 = vpack.c.bf16 %v1609_v31, %v1505_v38 }
 0x322   :  { %v1695_v10 = vsel %vm1612_vm4, %v1694_v61, %v1693_v18 }
 0x323   :  { %v1698_v15 = vsel %vm1611_vm13, %v3190_v9, %v1695_v10  ;;  %2042 = vmatpush3.bf16.msra.mxu0 %v2041_v1  ;;  %v1716_v9 = vld [vmem:[%s3422_s5 + $0x10] sm:$0xf]  ;;  %s2163_s5 = scalar_lea.vmem %s1834_s19, 384 }
 0x324   :  { %2159 = vcosq.f32 %v1698_v15  ;;  %2005 = vmatprep.subr.mxu0 %v2196_v48  ;;  %p2164_p0 = scmp.ne.s32.totalorder %s1834_s19, %s2163_s5  ;;  %p2169_p2 = scmp.lt.s32.totalorder %s2163_s5, %s2163_s5 }
 0x325   :  { %2161 = vsinq.f32 %v1698_v15 }
 0x326   :  { %p2170_p3 = por %p2169_p2, %p2168_p1 }
 0x328   :  { %p2171_p4 = pnand %p2170_p3, %p2164_p0 }
 0x32e   :  { %v2160_v2 = vpop.eup %2159 }
 0x32f   :  { %v2162_v24 = vpop.eup %2161  ;;  %v1710_v21 = vxor.u32 2147483648, %v2160_v2 }
 0x330   :  { %v1707_v42 = vxor.u32 2147483648, %v2162_v24 }
 0x331   :  { %v1711_v7 = vsel %vm1709_vm8, %v1710_v21, %v2162_v24 }
 0x332   :  { %v1708_v8 = vsel %vm1706_vm7, %v2160_v2, %v1707_v42 }
 0x333   :  { %v1712_v19 = vsel %vm1705_vm12, %v1708_v8, %v1711_v7 }
 0x334   :  { %v1713_v34 = vsel %vm1702_vm15, nan, %v1712_v19 }
 0x335   :  { %2006 = vmatpush3.msra.mxu0 %v1713_v34 }
 0x336   :  { %2008 = vmatmul.mubr.msk.f32.vlgmr.msra.gmra.mrb[8].mxu0 %vm1735_vm2, %v1714_v47 }
 0x337   :  { %2010 = vmatprep.mubr.msk.f32.mxu0 %vm2195_vm3, %v2196_v48 }
 0x33a   :  { %2011 = vmatmul.mubr.msk.f32.gmra.mrb[10].mxu0 %vm1735_vm2, %v1715_v50 }
 0x33b   :  { %2013 = vmatprep.mubr.msk.f32.mxu0 %vm2195_vm3, %v2196_v48 }
 0x33e   :  { %2014 = vmatmul.mubr.msk.f32.gmra.mrb[12].mxu0 %vm1735_vm2, %v1716_v9 }
 0x409   :  { %v1811_v12 = vpop.f32.mrb[8].mxu0 }
 0x40a   :  { %v1812_v32 = vadd.f32 %v1811_v12, %v1723_v46  ;;  %v2009_v36 = vpop.f32.mrb[9].mxu0 }
 0x40c   :  { %1825 = vst [vmem:[#allocation2] sm:$0xff] %v1812_v32 }
 0x40d   :  { %v1816_v41 = vpop.f32.mrb[10].mxu0 }
 0x40e   :  { %v1817_v43 = vadd.f32 %v1816_v41, %v1728_v59  ;;  %v2012_v11 = vpop.f32.mrb[11].mxu0 }
 0x410   :  { %1826 = vst [vmem:[#allocation2 + $0x8] sm:$0xff] %v1817_v43 }
 0x411   :  { %v1821_v13 = vpop.f32.mrb[12].mxu0 }
 0x412   :  { %v1822_v48 = vadd.f32 %v1821_v13, %v1733_v23  ;;  %v2015_v58 = vpop.f32.mrb[13].mxu0 }
 0x414   :  { %1827 = vst [vmem:[#allocation2 + $0x10] sm:$0xf] %v1822_v48 }
 0x415   :  { %2174 = shalt.err (!%p2171_p4)
}
 0x416   :  { %s2175_s22 = scalar_lea.hbm %s3424_s7, 384 }
 0x417   :  { %p2176_p5 = scmp.ne.s32.totalorder %s3424_s7, %s2175_s22  ;;  %p2179_p6 = scmp.lt.u32.totalorder %s2175_s22, %s3424_s7 }
 0x419   :  { %p2181_p7 = pnand %p2179_p6, %p2176_p5 }
 0x41b   :  { %2184 = shalt.err (!%p2181_p7)
}
 0x41c   :  { %s2199_s26 = smov 128   ;;  %s2200_s27 = smov 8  }
 0x41d   :  { %1839 = dma.vmem_to_hbm [thread:$0]  %s1834_s19, 384, %s3424_s7, [#allocation3], %s2199_s26, %s2199_s26, %s2200_s27  }
 0x41e   :  { %2185 = dma.done.wait [#allocation3], 384  }
 0x41f   :  { %2186 = vsyncadd [#allocation3], 4294966912 }
 0x420   :  { %1843 = vsyncpa [#allocation3], 1 }

</bundles_post_ra>
